<compile_context>
chip_gen: v6e
topology: v6e:2x2x1
jax: 0.10.0
libtpu: 0.0.40
codegen_flags: <defaults>
</compile_context>

<pallas_src>
import functools

import jax
import jax.numpy as jnp
from jax.experimental import pallas as pl
from jax.experimental.pallas import tpu as pltpu

H = 128          # hidden width (fixed by the module)
TB_DEFAULT = 1024  # batch tile on the lane axis (multiple of 128)


def _mlp_kernel(x_ref, slabs_ref, w2_ref, b3_ref, o_ref, *, compute_dtype):
    # x_ref    : (1, TB)       input batch tile (batch on lanes)
    # slabs_ref: (4, H, TB)    lane-dense pre-broadcast column params, resident:
    #                          [0]=fc1.weight, [1]=fc1.bias, [2]=fc2.bias,
    #                          [3]=fc3.weight (as a column, broadcast over lanes)
    # w2_ref   : (H, H)        fc2.weight in PyTorch [out, in] form, resident
    # b3_ref   : (1, 1) SMEM   fc3.bias scalar
    # o_ref    : (1, TB)       output tile
    x = x_ref[...]                                              # (1, TB)

    # fc1: K=1 "matmul" == outer product -> pure VPU elementwise (the lane
    # broadcasts of w1/b1 were hoisted into the wrapper slabs).
    pre1 = slabs_ref[0] * x + slabs_ref[1]                      # (H, TB) f32
    h1 = jnp.tanh(pre1.astype(compute_dtype))

    # fc2: the only real matmul, runs on the MXU with f32 accumulation.
    pre2 = jnp.dot(w2_ref[...], h1,
                   preferred_element_type=jnp.float32) + slabs_ref[2]
    h2 = jnp.tanh(pre2.astype(compute_dtype)).astype(jnp.float32)   # (H, TB)

    # fc3: M=1 -> elementwise multiply + sublane reduction (VPU/XLU).
    y = jnp.sum(slabs_ref[3] * h2, axis=0, keepdims=True) + b3_ref[0, 0]
    o_ref[...] = y.astype(o_ref.dtype)                          # (1, TB)


def enhanced_nn_forward(x, params, *, tb=TB_DEFAULT, compute_dtype=jnp.float32):
    """x: f32[B, 1] -> f32[B, 1]. params are in PyTorch nn.Linear layout."""
    W1, b1, W2, b2, W3, b3 = params
    B = x.shape[0]

    assert tb % 128 == 0 and tb > 0
    # Keep >= 2 "parallel" grid steps when the batch fits in one tile so v7x's
    # second TensorCore gets work (and avoid gross padding for tiny batches).
    if B <= tb:
        tb = max(128, ((B + 1) // 2 + 127) // 128 * 128)
    n_blocks = pl.cdiv(B, tb)
    Bp = n_blocks * tb

    # Lane-dense layout: batch on the lane axis, zero-padded to a tile multiple.
    x_row = jnp.pad(x.reshape(1, B).astype(jnp.float32), ((0, 0), (0, Bp - B)))

    # Pre-broadcast the small column params to lane-dense (H, tb) slabs and
    # stack them: one dense DMA, resident across all grid steps, and no
    # per-step lane-broadcast ops inside the kernel body.
    slabs = jnp.stack([
        jnp.broadcast_to(W1.reshape(H, 1), (H, tb)),     # fc1.weight
        jnp.broadcast_to(b1.reshape(H, 1), (H, tb)),     # fc1.bias
        jnp.broadcast_to(b2.reshape(H, 1), (H, tb)),     # fc2.bias
        jnp.broadcast_to(W3.reshape(H, 1), (H, tb)),     # fc3.weight column
    ]).astype(jnp.float32)

    w2m = W2.astype(compute_dtype)       # [out, in] is exactly W for W @ h
    b3s = b3.reshape(1, 1).astype(jnp.float32)

    # Rough per-kernel VMEM budget: double-buffered slabs + w2 + x/out tiles,
    # plus headroom for the (H, tb) intermediates.  Capped at 64 MiB (v7x
    # physical); floored at 16 MiB (v5e default scoped limit).
    est = (2 * 4 * H * tb * 4      # slab input, double-buffered
           + 2 * H * H * 4         # w2, double-buffered
           + 2 * 2 * tb * 4        # x / out tiles, double-buffered
           + 4 * H * tb * 4)       # h1/h2/temporaries headroom
    vmem_limit = int(min(64 * 1024 * 1024, max(16 * 1024 * 1024, est * 3 // 2)))

    kernel = functools.partial(_mlp_kernel, compute_dtype=compute_dtype)
    out_row = pl.pallas_call(
        kernel,
        out_shape=jax.ShapeDtypeStruct((1, Bp), jnp.float32),
        grid_spec=pltpu.PrefetchScalarGridSpec(
            num_scalar_prefetch=0,
            grid=(n_blocks,),
            in_specs=[
                pl.BlockSpec((1, tb), lambda i: (0, i)),              # x tile
                pl.BlockSpec((4, H, tb), lambda i: (0, 0, 0)),        # param slabs
                pl.BlockSpec((H, H), lambda i: (0, 0)),               # w2
                pl.BlockSpec(memory_space=pltpu.MemorySpace.SMEM),    # b3 scalar
            ],
            out_specs=pl.BlockSpec((1, tb), lambda i: (0, i)),
        ),
        compiler_params=pltpu.CompilerParams(
            dimension_semantics=("parallel",),   # batch axis -> both TCs on v7x
            vmem_limit_bytes=vmem_limit,
        ),
    )(x_row, slabs, w2m, b3s)

    return out_row[0, :B].reshape(B, 1)


def init_params(key):
    """Deterministic synthetic parameters in PyTorch layout (weight: [out, in])."""
    k1, k2, k3, k4, k5, k6 = jax.random.split(key, 6)
    W1 = jax.random.normal(k1, (H, 1), jnp.float32) * 0.5               # fc1.weight
    b1 = jax.random.normal(k2, (H,), jnp.float32) * 0.1                 # fc1.bias
    W2 = jax.random.normal(k3, (H, H), jnp.float32) * (1.0 / jnp.sqrt(H))
    b2 = jax.random.normal(k4, (H,), jnp.float32) * 0.1
    W3 = jax.random.normal(k5, (1, H), jnp.float32) * (1.0 / jnp.sqrt(H))
    b3 = jax.random.normal(k6, (1,), jnp.float32) * 0.1
    return (W1, b1, W2, b2, W3, b3)


def reference_forward(x, params):
    W1, b1, W2, b2, W3, b3 = params
    h1 = jnp.tanh(x @ W1.T + b1)
    h2 = jnp.tanh(h1 @ W2.T + b2)
    return h2 @ W3.T + b3


if __name__ == "__main__":
    key = jax.random.PRNGKey(0)
    pkey, xkey = jax.random.split(key)
    params = init_params(pkey)

    # Non-multiple batch on purpose: exercises the wrapper padding path and the
    # "split into >= 2 parallel grid steps" logic (B=1000 -> tb=512, 2 steps).
    B = 1000
    x = jax.random.normal(xkey, (B, 1), jnp.float32)

    out = jax.block_until_ready(enhanced_nn_forward(x, params))
    ref = reference_forward(x, params)

    assert out.shape == (B, 1)
    assert jnp.allclose(out, ref, atol=1e-4, rtol=1e-4), "mismatch vs JAX reference"

    print("KERNEL_OK")
</pallas_src>

<mosaic_0001>
module attributes {stable_mosaic.version = 11 : i64} {
  func.func @_mlp_kernel(%arg0: i32, %arg1: memref<1x512xf32, #tpu.memory_space<vmem>>, %arg2: memref<4x128x512xf32, #tpu.memory_space<vmem>>, %arg3: memref<128x128xf32, #tpu.memory_space<vmem>>, %arg4: memref<1x1xf32, #tpu.memory_space<smem>>, %arg5: memref<1x512xf32, #tpu.memory_space<vmem>>) attributes {dimension_semantics = [#tpu.dimension_semantics<parallel>], iteration_bounds = array<i64: 2>, scalar_prefetch = 0 : i64, scratch_operands = 0 : i64, tpu.core_type = #tpu.core_type<tc>, window_params = [{transform_indices = @transform_0, window_bounds = array<i64: 1, 512>}, {pipeline_mode = #tpu.pipeline_mode<synchronous>, transform_indices = @transform_1, window_bounds = array<i64: 4, 128, 512>}, {pipeline_mode = #tpu.pipeline_mode<synchronous>, transform_indices = @transform_2, window_bounds = array<i64: 128, 128>}, {transform_indices = @transform_3, window_bounds = array<i64: 1, 1>}, {transform_indices = @transform_4, window_bounds = array<i64: 1, 512>}]} {
    %c0 = arith.constant 0 : index
    %c0_0 = arith.constant 0 : index
    %0 = vector.load %arg1[%c0, %c0_0] : memref<1x512xf32, #tpu.memory_space<vmem>>, vector<1x512xf32>
    %c0_1 = arith.constant 0 : index
    %c0_2 = arith.constant 0 : index
    %c0_3 = arith.constant 0 : index
    %1 = vector.load %arg2[%c0_1, %c0_2, %c0_3] : memref<4x128x512xf32, #tpu.memory_space<vmem>>, vector<1x128x512xf32>
    %2 = vector.shape_cast %1 : vector<1x128x512xf32> to vector<128x512xf32>
    %3 = vector.broadcast %0 : vector<1x512xf32> to vector<128x512xf32>
    %4 = arith.mulf %2, %3 : vector<128x512xf32>
    %c1 = arith.constant 1 : index
    %c0_4 = arith.constant 0 : index
    %c0_5 = arith.constant 0 : index
    %5 = vector.load %arg2[%c1, %c0_4, %c0_5] : memref<4x128x512xf32, #tpu.memory_space<vmem>>, vector<1x128x512xf32>
    %6 = vector.shape_cast %5 : vector<1x128x512xf32> to vector<128x512xf32>
    %7 = arith.addf %4, %6 : vector<128x512xf32>
    %8 = math.tanh %7 : vector<128x512xf32>
    %c0_6 = arith.constant 0 : index
    %c0_7 = arith.constant 0 : index
    %9 = vector.load %arg3[%c0_6, %c0_7] : memref<128x128xf32, #tpu.memory_space<vmem>>, vector<128x128xf32>
    %cst = arith.constant dense<0.000000e+00> : vector<128x512xf32>
    %10 = tpu.matmul %9, %8, %cst {dimension_numbers = #tpu.dot_dimension_numbers<[1], [0], [0], [1], [0, 0, 1, 1], [], []>} : vector<128x128xf32>, vector<128x512xf32>, vector<128x512xf32> -> vector<128x512xf32>
    %c2 = arith.constant 2 : index
    %c0_8 = arith.constant 0 : index
    %c0_9 = arith.constant 0 : index
    %11 = vector.load %arg2[%c2, %c0_8, %c0_9] : memref<4x128x512xf32, #tpu.memory_space<vmem>>, vector<1x128x512xf32>
    %12 = vector.shape_cast %11 : vector<1x128x512xf32> to vector<128x512xf32>
    %13 = arith.addf %10, %12 : vector<128x512xf32>
    %14 = math.tanh %13 : vector<128x512xf32>
    %c3 = arith.constant 3 : index
    %c0_10 = arith.constant 0 : index
    %c0_11 = arith.constant 0 : index
    %15 = vector.load %arg2[%c3, %c0_10, %c0_11] : memref<4x128x512xf32, #tpu.memory_space<vmem>>, vector<1x128x512xf32>
    %16 = vector.shape_cast %15 : vector<1x128x512xf32> to vector<128x512xf32>
    %17 = arith.mulf %16, %14 : vector<128x512xf32>
    %cst_12 = arith.constant dense<0.000000e+00> : vector<512xf32>
    %18 = vector.multi_reduction <add>, %17, %cst_12 [0] : vector<128x512xf32> to vector<512xf32>
    %19 = vector.shape_cast %18 : vector<512xf32> to vector<1x512xf32>
    %c0_13 = arith.constant 0 : index
    %c0_14 = arith.constant 0 : index
    %20 = memref.load %arg4[%c0_13, %c0_14] : memref<1x1xf32, #tpu.memory_space<smem>>
    %21 = vector.broadcast %20 : f32 to vector<1x512xf32>
    %22 = arith.addf %19, %21 : vector<1x512xf32>
    %c0_15 = arith.constant 0 : index
    %c0_16 = arith.constant 0 : index
    %23 = vector.load %arg5[%c0_15, %c0_16] : memref<1x512xf32, #tpu.memory_space<vmem>>, vector<1x512xf32>
    tpu.vector_store %arg5[%c0_15, %c0_16], %22 {strides = array<i32>} : memref<1x512xf32, #tpu.memory_space<vmem>>, vector<1x512xf32>,
    return
  }
  func.func @transform_0(%arg0: i32) -> (i32, i32) {
    %c0_i32 = arith.constant 0 : i32
    %c0_i32_0 = arith.constant 0 : i32
    return %c0_i32, %arg0 : i32, i32
  }
  func.func @transform_1(%arg0: i32) -> (i32, i32, i32) {
    %c0_i32 = arith.constant 0 : i32
    %c0_i32_0 = arith.constant 0 : i32
    %c0_i32_1 = arith.constant 0 : i32
    %c0_i32_2 = arith.constant 0 : i32
    return %c0_i32, %c0_i32_0, %c0_i32_1 : i32, i32, i32
  }
  func.func @transform_2(%arg0: i32) -> (i32, i32) {
    %c0_i32 = arith.constant 0 : i32
    %c0_i32_0 = arith.constant 0 : i32
    %c0_i32_1 = arith.constant 0 : i32
    return %c0_i32, %c0_i32_0 : i32, i32
  }
  func.func @transform_3(%arg0: i32) -> (i32, i32) {
    %c0_i32 = arith.constant 0 : i32
    %c0_i32_0 = arith.constant 0 : i32
    %c0_i32_1 = arith.constant 0 : i32
    return %c0_i32, %c0_i32_0 : i32, i32
  }
  func.func @transform_4(%arg0: i32) -> (i32, i32) {
    %c0_i32 = arith.constant 0 : i32
    %c0_i32_0 = arith.constant 0 : i32
    return %c0_i32, %arg0 : i32, i32
  }
}

</mosaic_0001>

<bundles_post_ra>
// kernel: tpu_custom_call.1
= control target key start
LH: loop header
LB: loop body
LE: loop exit
PB: predicated region body
PF: predicated region fallthrough
CT: control target
= control target key end

     0   :  { %s2364_s0 = inlined_call_operand.hbm [shape: f32[1,1024], index: 0, kind: input, shape index: {}]   ;;  %s2365_s1 = inlined_call_operand.hbm [shape: f32[4,128,512], index: 1, kind: input, shape index: {}]   ;;  %s2366_s2 = inlined_call_operand.hbm [shape: f32[128,128], index: 2, kind: input, shape index: {}]   ;;  %s2367_s3 = inlined_call_operand.<no memory space> [shape: f32[1,1], index: 3, kind: input, shape index: {}]   ;;  %s2368_s4 = inlined_call_operand.hbm [shape: f32[1,1024], index: 4, kind: output, shape index: {}]  }
   0x1   :  { %9 = sst [smem:[#allocation2]] %s2367_s3 }
   0x2   :  { %10 = vsyncpa [#allocation4], 0 }
   0x3   :  { %12 = vsyncpa [#allocation4 + $0x1], 0 }
   0x4   :  { %13 = vsyncpa [#allocation7], 0 }
   0x5   :  { %14 = vsyncpa [#allocation5], 0 }
   0x6   :  { %16 = vsyncpa [#allocation5 + $0x1], 0  ;;  %s1950_s17 = smov 0   ;;  %s1952_s18 = smov 0  }
   0x7   :  { %s1954_s19 = smov 0   ;;  %s1956_s20 = smov 0  }
   0x8 LB: > { %s1971_s3 = sadd.s32 4294967295, %s1910_s20   ;;  %s1413_s21 = sadd.s32 4294967294, %s1910_s20   ;;  %s1910_s20 = sphi %s1956_s20, %s2390_s20   ;;  %s1906_s19 = sphi %s1954_s19, %s2389_s19   ;;  %s1902_s18 = sphi %s1952_s18, %s2388_s18   ;;  %s1898_s17 = sphi %s1950_s17, %s2387_s17  }
   0x9   : > { %p42_p0 = scmp.ne.s32.totalorder %s1902_s18, %s1898_s17  ;;  %p2369_p1 = scmp.eq.s32.totalorder %s1971_s3, 0 }
   0xa   : > { %p135_p3 = scmp.eq.s32.totalorder %s1413_s21, 1  ;;  %p1414_p5 = scmp.ge.s32.totalorder %s1910_s20, 1 }
   0xb   : > { %p1980_p4 = por %p2369_p1, %p42_p0  ;;  %p142_p7 = scmp.lt.s32.totalorder %s1910_s20, 3 }
   0xc   : > { %p1985_p6 = por %p135_p3, %p42_p0  ;;  %s1912_s25 = smov [#allocation6]  }
   0xd   : > { %s2373_s22 = scalar_select %p1980_p4, 1, 0 }
   0xe   : > { %s2374_s23 = scalar_select %p1985_p6, 1, 0 }
   0xf   : > { %p1990_p8 = pnand %p1414_p5, %p142_p7  ;;  %s154_s26 = sshll.u32 %s1912_s25, 4  ;;  %s155_s26 = int_to_ptr.vmem [resolvable:$true] %s154_s26 }
  0x10   : > { %s1913_s28 = smov [#allocation8]   ;;  %s1773_s30 = scalar_lea.vmem %s155_s26, 32768 }
  0x11   : > { %s2375_s24 = scalar_select %p1990_p8, 1, 0 }
  0x12   : > { %p1445_p9 = pneg %p1990_p8  ;;  %s167_s29 = sshll.u32 %s1913_s28, 4  ;;  %s168_s29 = int_to_ptr.vmem [resolvable:$true] %s167_s29 }
  0x13   : > { %p1774_p13 = scmp.ne.s32.totalorder %s155_s26, %s1773_s30  ;;  %p1781_p5 = scmp.lt.s32.totalorder %s155_s26, %s155_s26 }
  0x14   : > { %p1999_p11 = pnand %p1445_p9, %p2369_p1  ;;  %p1782_p7 = scmp.lt.s32.totalorder %s1773_s30, %s1773_s30 }
  0x16   : > { %p1764_p12 = pneg %p1999_p11  ;;  %p1783_p10 = por %p1782_p7, %p1781_p5 }
  0x18   : > { %p1776_p0 = pnand %p1774_p13, %p1764_p12 }
  0x1a   : > { %p1777_p3 = pneg %p1776_p0 }
  0x1c   : > { %p1784_p9 = pnand %p1783_p10, %p1777_p3 }
  0x1e   : > { %1787 = shalt.err (!%p1784_p9)
}
  0x1f   : > { %s1914_s5 = smov 512   ;;  %s1915_s6 = smov 32  }
  0x20   : > { %1448 = dma.hbm_to_vmem [thread:$0]  (!%p1999_p11), %s2365_s1, 32768, %s155_s26, [#allocation7], %s1914_s5, %s1914_s5, %s1915_s6  }
  0x21   : > { %s1799_s9 = scalar_lea.vmem %s168_s29, 2048  ;;  %p1807_p2 = scmp.lt.s32.totalorder %s168_s29, %s168_s29 }
  0x22   : > { %p1800_p1 = scmp.ne.s32.totalorder %s168_s29, %s1799_s9  ;;  %p1808_p6 = scmp.lt.s32.totalorder %s1799_s9, %s1799_s9 }
  0x24   : > { %p1802_p13 = pnand %p1800_p1, %p1764_p12  ;;  %p1809_p5 = por %p1808_p6, %p1807_p2 }
  0x26   : > { %p1803_p0 = pneg %p1802_p13 }
  0x28   : > { %p1810_p10 = pnand %p1809_p5, %p1803_p0 }
  0x2a   : > { %1813 = shalt.err (!%p1810_p10)
}
  0x2b   : > { %s1916_s10 = smov 128   ;;  %s1917_s11 = smov 8  }
  0x2c   : > { %1451 = dma.hbm_to_vmem [thread:$0]  (!%p1999_p11), %s2366_s2, 2048, %s168_s29, [#allocation7], %s1916_s10, %s1916_s10, %s1917_s11  }
  0x2d   : > { %s2022_s14 = sadd.s32 1, %s1910_s20   ;;  %s29_s16 = sadd.s32 1, %s1906_s19 }
  0x2e   : > { %s26_s15 = ssub.s32 %s1910_s20, %s2022_s14  ;;  %p36_p2 = scmp.ne.s32.totalorder %s1906_s19, %s1902_s18 }
  0x2f   : > { %p27_p1 = scmp.eq.s32.totalorder %s26_s15, 0  ;;  %p37_p6 = scmp.eq.s32.totalorder %s1910_s20, 0 }
  0x30   : > { %p2377_p3 = scmp.eq.s32.totalorder %s1971_s3, 1  ;;  %p1462_p9 = scmp.lt.s32.totalorder %s1910_s20, 2 }
  0x31   : > { %s2031_s21 = scalar_select %p27_p1, %s1906_s19, %s29_s16  }
  0x32   : > { %p38_p12 = por %p37_p6, %p36_p2  ;;  %p2035_p7 = por %p2377_p3, %p36_p2 }
  0x33   : > { %s184_s26 = sand.u32 1, %s1906_s19   ;;  %s1431_s28 = sshll.u32 %s1910_s20, 6 }
  0x34   : > { %s2378_s25 = scalar_select %p2035_p7, 1, 0 }
  0x35   : > { %s1418_s27 = sshll.u32 %s184_s26, 2  ;;  %s2045_s5 = scalar_lea.hbm %s2364_s0, %s1431_s28 }
  0x36   : > { %s188_s6 = scalar_lea.vmem [#allocation3], %s1418_s27  ;;  %p2047_p11 = pnand %p1462_p9, %p38_p12 }
  0x37   : > { %s196_s7 = sshll.u32 %s188_s6, 4  ;;  %s185_s9 = scalar_lea.sflag [#allocation4], %s184_s26  ;;  %s197_s7 = int_to_ptr.vmem [resolvable:$true] %s196_s7 }
  0x38   : > { %s1814_s10 = scalar_lea.hbm %s2045_s5, 64  ;;  %p1816_p0 = pneg %p2047_p11 }
  0x39   : > { %p1815_p13 = scmp.ne.s32.totalorder %s2045_s5, %s1814_s10  ;;  %s1819_s13 = scalar_lea.hbm %s2364_s0, 128 }
  0x3a   : > { %p1820_p1 = scmp.lt.s32.totalorder %s2045_s5, %s2364_s0  ;;  %p1821_p2 = scmp.lt.s32.totalorder %s1819_s13, %s1814_s10 }
  0x3b   : > { %p1817_p5 = pnand %p1816_p0, %p1815_p13 }
  0x3c   : > { %p1822_p6 = por %p1821_p2, %p1820_p1 }
  0x3d   : > { %p1818_p10 = pneg %p1817_p5 }
  0x3f   : > { %p1823_p12 = pnand %p1822_p6, %p1818_p10 }
  0x41   : > { %1826 = shalt.err (!%p1823_p12)
}
  0x42   : > { %s1827_s27 = scalar_lea.vmem %s197_s7, 64  ;;  %s1918_s26 = smov [#allocation3]  }
  0x43   : > { %p1828_p3 = scmp.ne.s32.totalorder %s197_s7, %s1827_s27  ;;  %s1832_s28 = sshll.u32 %s1918_s26, 4  ;;  %s1833_s28 = int_to_ptr.vmem [resolvable:$false] %s1832_s28 }
  0x44   : > { %s1834_s29 = scalar_lea.vmem %s1833_s28, 128  ;;  %p1835_p13 = scmp.lt.s32.totalorder %s197_s7, %s1833_s28 }
  0x45   : > { %p1830_p9 = pnand %p1828_p3, %p1816_p0  ;;  %p1836_p5 = scmp.lt.s32.totalorder %s1834_s29, %s1827_s27 }
  0x47   : > { %p1831_p7 = pneg %p1830_p9  ;;  %p1837_p4 = por %p1836_p5, %p1835_p13 }
  0x49   : > { %p1838_p8 = pnand %p1837_p4, %p1831_p7 }
  0x4b   : > { %1841 = shalt.err (!%p1838_p8)
}
  0x4c   : > { %1455 = dma.hbm_to_vmem [thread:$0]  (!%p2047_p11), %s2045_s5, 64, %s197_s7, %s185_s9  }
  0x4d   : > { %p2380_p10 = scmp.ne.s32.totalorder %s2375_s24, 0 }
  0x4e   : > { %s2068_s30 = sand.u32 (!%p2380_p10), 1, %s1902_s18   ;;  %p2381_p4 = scmp.ne.s32.totalorder (!%p2380_p10), %s2373_s22, 0 }
  0x4f   : > { %205 = sbr.rel (%p2380_p10) target bundleno = 488 (0x1e8), region = 36  ;;  %s1422_s6 = sshll.u32 (!%p2380_p10), %s2068_s30, 2 }
  0x50   : > { %s208_s10 = scalar_lea.sflag (!%p2380_p10), [#allocation4], %s2068_s30  ;;  %s211_s11 = scalar_lea.vmem (!%p2380_p10), [#allocation3], %s1422_s6 }
  0x54   : > { %1885 = dma.done.wait (%p2381_p4), %s208_s10, 64  }
  0x55   : > { %1887 = vsyncadd (%p2381_p4), %s208_s10, 4294967232  ;;  %p2382_p8 = scmp.eq.s32.totalorder %s1971_s3, 0 }
  0x57   : > { %1889 = dma.done.wait (%p2382_p8), [#allocation7], 34816   ;;  %p2383_p7 = pmov %p2382_p8 }
  0x58   : > { %v312_v0 = vlaneseq  ;;  %v1919_v1 = vmov 0.0   ;;  %v246_v7 = vld [vmem:[%s211_s11] sm:$0xf]  ;;  %v308_v8 = vld [vmem:[#allocation6 + $0x1e8] sm:$0xff]  ;;  %v307_v15 = vld [vmem:[#allocation6 + $0x1e0] sm:$0xff]  ;;  %s1269_s22 = sld [smem:[#allocation2]] }
  0x59   : > { %1891 = vsyncadd (%p2383_p7), [#allocation7], 4294932480  ;;  %734 = vmatprep.mubr.f32.mxu0 %v1919_v1  ;;  %895 = vmatprep.mubr.f32.mxu1 %v1919_v1  ;;  %v458_v12 = vld [vmem:[#allocation6 + $0x3e8] sm:$0xff]  ;;  %v310_v13 = vld [vmem:[#allocation6 + $0x1f8] sm:$0xff]  ;;  %s1432_s24 = sshll.u32 %s1971_s3, 6  ;;  %s243_s5 = scalar_lea.vmem [#allocation9], %s1422_s6 }
  0x5a   : > { %v2085_v2 = vshrl.u32 %v312_v0, 7  ;;  %v460_v16 = vld [vmem:[#allocation6 + $0x3f8] sm:$0xff]  ;;  %v457_v17 = vld [vmem:[#allocation6 + $0x3e0] sm:$0xff]  ;;  %v309_v18 = vld [vmem:[#allocation6 + $0x1f0] sm:$0xff]  ;;  %s1324_s7 = sshll.u32 %s243_s5, 4  ;;  %vm1306_vm0 = vcmp.lt.s32.totalorder %v312_v0, 512  ;;  %s1322_s12 = scalar_lea.hbm %s2368_s4, %s1432_s24  ;;  %s1325_s7 = int_to_ptr.vmem [resolvable:$true] %s1324_s7 }
  0x5b   : > { %v459_v23 = vld [vmem:[#allocation6 + $0x3f0] sm:$0xff]  ;;  %v304_v24 = vld [vmem:[#allocation6 + $0x1c8] sm:$0xff]  ;;  %v306_v25 = vld [vmem:[#allocation6 + $0x1d8] sm:$0xff]  ;;  %s1310_s13 = scalar_lea.sflag [#allocation5], %s2068_s30  ;;  %s1842_s15 = scalar_lea.vmem %s1325_s7, 64 }
  0x5c   : > { %v314_v3 = vsub.s32 0, %v2085_v2  ;;  %v318_v4 = vsub.s32 1, %v2085_v2  ;;  %v322_v5 = vsub.s32 2, %v2085_v2  ;;  %v326_v6 = vsub.s32 3, %v2085_v2  ;;  %v454_v27 = vld [vmem:[#allocation6 + $0x3c8] sm:$0xff]  ;;  %v303_v29 = vld [vmem:[#allocation6 + $0x1c0] sm:$0xff]  ;;  %p1843_p11 = scmp.ne.s32.totalorder %s1325_s7, %s1842_s15 }
  0x5d   : > { %v456_v33 = vld [vmem:[#allocation6 + $0x3d8] sm:$0xff]  ;;  %v305_v34 = vld [vmem:[#allocation6 + $0x1d0] sm:$0xff]  ;;  %v300_v35 = vld [vmem:[#allocation6 + $0x1a8] sm:$0xff]  ;;  %p2384_p0 = scmp.ne.s32.totalorder %s2378_s25, 0  ;;  %s1921_s3 = smov [#allocation9]  }
  0x5e   : > { %v2091_v9 = vrot.slane %v246_v7, %v314_v3  ;;  %v2093_v10 = vrot.slane %v246_v7, %v318_v4  ;;  %v2095_v11 = vrot.slane %v246_v7, %v322_v5  ;;  %v2097_v14 = vrot.slane %v246_v7, %v326_v6  ;;  %v453_v38 = vld [vmem:[#allocation6 + $0x3c0] sm:$0xff]  ;;  %v302_v40 = vld [vmem:[#allocation6 + $0x1b8] sm:$0xff]  ;;  %v455_v42 = vld [vmem:[#allocation6 + $0x3d0] sm:$0xff]  ;;  %s1846_s16 = sshll.u32 %s1921_s3, 4  ;;  %s1847_s16 = int_to_ptr.vmem [resolvable:$false] %s1846_s16 }
  0x5f   : > { %v299_v44 = vld [vmem:[#allocation6 + $0x1a0] sm:$0xff]  ;;  %v301_v45 = vld [vmem:[#allocation6 + $0x1b0] sm:$0xff]  ;;  %v450_v47 = vld [vmem:[#allocation6 + $0x3a8] sm:$0xff]  ;;  %p1844_p1 = pnand %p1843_p11, %p2384_p0  ;;  %s1848_s27 = scalar_lea.vmem %s1847_s16, 128 }
  0x60   : > { %v393_v19 = vmul.f32 %v2093_v10, %v308_v8  ;;  %v395_v20 = vmul.f32 %v2097_v14, %v310_v13  ;;  %v392_v21 = vmul.f32 %v2091_v9, %v307_v15  ;;  %v394_v22 = vmul.f32 %v2095_v11, %v309_v18  ;;  %v296_v49 = vld [vmem:[#allocation6 + $0x188] sm:$0xff]  ;;  %v452_v51 = vld [vmem:[#allocation6 + $0x3b8] sm:$0xff]  ;;  %v449_v55 = vld [vmem:[#allocation6 + $0x3a0] sm:$0xff]  ;;  %p1849_p6 = scmp.lt.s32.totalorder %s1325_s7, %s1847_s16  ;;  %p1850_p12 = scmp.lt.s32.totalorder %s1848_s27, %s1842_s15 }
  0x61   : > { %v389_v26 = vmul.f32 %v2093_v10, %v304_v24  ;;  %v391_v28 = vmul.f32 %v2097_v14, %v306_v25  ;;  %v388_v37 = vmul.f32 %v2091_v9, %v303_v29  ;;  %v390_v39 = vmul.f32 %v2095_v11, %v305_v34  ;;  %v298_v53 = vld [vmem:[#allocation6 + $0x198] sm:$0xff]  ;;  %v295_v57 = vld [vmem:[#allocation6 + $0x180] sm:$0xff]  ;;  %v451_v59 = vld [vmem:[#allocation6 + $0x3b0] sm:$0xff]  ;;  %p1845_p2 = pneg %p1844_p1 }
  0x62   : > { %v522_v30 = vadd.f32 %v458_v12, %v393_v19  ;;  %v524_v31 = vadd.f32 %v460_v16, %v395_v20  ;;  %v521_v32 = vadd.f32 %v457_v17, %v392_v21  ;;  %v523_v36 = vadd.f32 %v459_v23, %v394_v22  ;;  %v297_v61 = vld [vmem:[#allocation6 + $0x190] sm:$0xff]  ;;  %v446_v63 = vld [vmem:[#allocation6 + $0x388] sm:$0xff]  ;;  %v448_v6 = vld [vmem:[#allocation6 + $0x398] sm:$0xff]  ;;  %p1851_p3 = por %p1850_p12, %p1849_p6 }
  0x63   : > { %v518_v41 = vadd.f32 %v454_v27, %v389_v26  ;;  %v385_v43 = vmul.f32 %v2093_v10, %v300_v35  ;;  %v520_v46 = vadd.f32 %v456_v33, %v391_v28  ;;  %v387_v48 = vmul.f32 %v2097_v14, %v302_v40  ;;  %v292_v4 = vld [vmem:[#allocation6 + $0x168] sm:$0xff]  ;;  %v294_v8 = vld [vmem:[#allocation6 + $0x178] sm:$0xff]  ;;  %v445_v13 = vld [vmem:[#allocation6 + $0x380] sm:$0xff] }
  0x64   : > { %1506 = vtanh.f32 %v522_v30  ;;  %v517_v50 = vadd.f32 %v453_v38, %v388_v37  ;;  %v384_v52 = vmul.f32 %v2091_v9, %v299_v44  ;;  %v519_v54 = vadd.f32 %v455_v42, %v390_v39  ;;  %v291_v16 = vld [vmem:[#allocation6 + $0x160] sm:$0xff]  ;;  %v447_v18 = vld [vmem:[#allocation6 + $0x390] sm:$0xff]  ;;  %v442_v22 = vld [vmem:[#allocation6 + $0x368] sm:$0xff]  ;;  %p1852_p9 = pnand %p1851_p3, %p1845_p2 }
  0x65   : > { %1508 = vtanh.f32 %v524_v31  ;;  %v386_v56 = vmul.f32 %v2095_v11, %v301_v45  ;;  %v514_v58 = vadd.f32 %v450_v47, %v385_v43  ;;  %v381_v60 = vmul.f32 %v2093_v10, %v296_v49  ;;  %v293_v20 = vld [vmem:[#allocation6 + $0x170] sm:$0xff]  ;;  %v288_v24 = vld [vmem:[#allocation6 + $0x148] sm:$0xff]  ;;  %v444_v26 = vld [vmem:[#allocation6 + $0x378] sm:$0xff] }
  0x66   : > { %1510 = vtanh.f32 %v521_v32  ;;  %v516_v62 = vadd.f32 %v452_v51, %v387_v48  ;;  %v383_v3 = vmul.f32 %v2097_v14, %v298_v53  ;;  %v513_v5 = vadd.f32 %v449_v55, %v384_v52  ;;  %v290_v28 = vld [vmem:[#allocation6 + $0x158] sm:$0xff]  ;;  %v441_v30 = vld [vmem:[#allocation6 + $0x360] sm:$0xff]  ;;  %v443_v34 = vld [vmem:[#allocation6 + $0x370] sm:$0xff] }
  0x67   : > { %1512 = vtanh.f32 %v523_v36  ;;  %v380_v7 = vmul.f32 %v2091_v9, %v295_v57  ;;  %v515_v12 = vadd.f32 %v451_v59, %v386_v56  ;;  %v382_v15 = vmul.f32 %v2095_v11, %v297_v61  ;;  %v287_v32 = vld [vmem:[#allocation6 + $0x140] sm:$0xff]  ;;  %v289_v36 = vld [vmem:[#allocation6 + $0x150] sm:$0xff]  ;;  %v438_v39 = vld [vmem:[#allocation6 + $0x348] sm:$0xff] }
  0x68   : > { %1514 = vtanh.f32 %v518_v41  ;;  %v510_v17 = vadd.f32 %v446_v63, %v381_v60  ;;  %v377_v19 = vmul.f32 %v2093_v10, %v292_v4  ;;  %v512_v21 = vadd.f32 %v448_v6, %v383_v3  ;;  %v284_v41 = vld [vmem:[#allocation6 + $0x128] sm:$0xff]  ;;  %v440_v44 = vld [vmem:[#allocation6 + $0x358] sm:$0xff]  ;;  %v437_v49 = vld [vmem:[#allocation6 + $0x340] sm:$0xff] }
  0x69   : > { %1516 = vtanh.f32 %v520_v46  ;;  %v379_v23 = vmul.f32 %v2097_v14, %v294_v8  ;;  %v509_v25 = vadd.f32 %v445_v13, %v380_v7  ;;  %v376_v27 = vmul.f32 %v2091_v9, %v291_v16  ;;  %v286_v46 = vld [vmem:[#allocation6 + $0x138] sm:$0xff]  ;;  %v283_v51 = vld [vmem:[#allocation6 + $0x120] sm:$0xff]  ;;  %v285_v56 = vld [vmem:[#allocation6 + $0x130] sm:$0xff] }
  0x6a   : > { %1518 = vtanh.f32 %v517_v50  ;;  %v511_v29 = vadd.f32 %v447_v18, %v382_v15  ;;  %v378_v31 = vmul.f32 %v2095_v11, %v293_v20  ;;  %v506_v33 = vadd.f32 %v442_v22, %v377_v19  ;;  %v434_v59 = vld [vmem:[#allocation6 + $0x328] sm:$0xff]  ;;  %v436_v3 = vld [vmem:[#allocation6 + $0x338] sm:$0xff]  ;;  %v433_v8 = vld [vmem:[#allocation6 + $0x320] sm:$0xff] }
  0x6b   : > { %1520 = vtanh.f32 %v519_v54  ;;  %v373_v35 = vmul.f32 %v2093_v10, %v288_v24  ;;  %v508_v38 = vadd.f32 %v444_v26, %v379_v23  ;;  %v375_v40 = vmul.f32 %v2097_v14, %v290_v28  ;;  %v439_v54 = vld [vmem:[#allocation6 + $0x350] sm:$0xff]  ;;  %v280_v61 = vld [vmem:[#allocation6 + $0x108] sm:$0xff]  ;;  %v279_v13 = vld [vmem:[#allocation6 + $0x100] sm:$0xff] }
  0x6c   : > { %1522 = vtanh.f32 %v514_v58  ;;  %v505_v43 = vadd.f32 %v441_v30, %v376_v27  ;;  %v372_v45 = vmul.f32 %v2091_v9, %v287_v32  ;;  %v507_v48 = vadd.f32 %v443_v34, %v378_v31  ;;  %v281_v19 = vld [vmem:[#allocation6 + $0x110] sm:$0xff]  ;;  %v430_v22 = vld [vmem:[#allocation6 + $0x308] sm:$0xff]  ;;  %v432_v27 = vld [vmem:[#allocation6 + $0x318] sm:$0xff] }
  0x6d   : > { %1524 = vtanh.f32 %v516_v62  ;;  %v374_v50 = vmul.f32 %v2095_v11, %v289_v36  ;;  %v502_v53 = vadd.f32 %v438_v39, %v373_v35  ;;  %v369_v55 = vmul.f32 %v2093_v10, %v284_v41  ;;  %v276_v24 = vld [vmem:[#allocation6 + $0xe8] sm:$0xff]  ;;  %v429_v32 = vld [vmem:[#allocation6 + $0x300] sm:$0xff]  ;;  %v277_v39 = vld [vmem:[#allocation6 + $0xf0] sm:$0xff] }
  0x6e   : > { %1526 = vtanh.f32 %v513_v5  ;;  %v504_v58 = vadd.f32 %v440_v44, %v375_v40  ;;  %v371_v60 = vmul.f32 %v2097_v14, %v286_v46  ;;  %v501_v63 = vadd.f32 %v437_v49, %v372_v45  ;;  %v282_v5 = vld [vmem:[#allocation6 + $0x118] sm:$0xff]  ;;  %v275_v34 = vld [vmem:[#allocation6 + $0xe0] sm:$0xff]  ;;  %v272_v44 = vld [vmem:[#allocation6 + $0xc8] sm:$0xff] }
  0x6f   : > { %1528 = vtanh.f32 %v515_v12  ;;  %v368_v4 = vmul.f32 %v2091_v9, %v283_v51  ;;  %v503_v7 = vadd.f32 %v439_v54, %v374_v50  ;;  %v370_v12 = vmul.f32 %v2095_v11, %v285_v56  ;;  %v274_v49 = vld [vmem:[#allocation6 + $0xd8] sm:$0xff]  ;;  %v271_v54 = vld [vmem:[#allocation6 + $0xc0] sm:$0xff] }
  0x70   : > { %1530 = vtanh.f32 %v510_v17  ;;  %v498_v16 = vadd.f32 %v434_v59, %v369_v55  ;;  %v435_v17 = vld [vmem:[#allocation6 + $0x330] sm:$0xff]  ;;  %v365_v18 = vmul.f32 %v2093_v10, %v280_v61  ;;  %v367_v23 = vmul.f32 %v2097_v14, %v282_v5 }
  0x71   : > { %v1507_v37 = vpop.eup %1506  ;;  %1532 = vtanh.f32 %v512_v21  ;;  %v500_v21 = vadd.f32 %v436_v3, %v371_v60  ;;  %v497_v26 = vadd.f32 %v433_v8, %v368_v4  ;;  %v364_v28 = vmul.f32 %v2091_v9, %v279_v13  ;;  %v273_v59 = vld [vmem:[#allocation6 + $0xd0] sm:$0xff]  ;;  %v268_v3 = vld [vmem:[#allocation6 + $0xa8] sm:$0xff]  ;;  %v270_v8 = vld [vmem:[#allocation6 + $0xb8] sm:$0xff] }
  0x72   : > { %v1509_v42 = vpop.eup %1508  ;;  %670 = vmatprep.subr.mxu0 %v1507_v37  ;;  %1534 = vtanh.f32 %v509_v25  ;;  %v499_v31 = vadd.f32 %v435_v17, %v370_v12  ;;  %v494_v36 = vadd.f32 %v430_v22, %v365_v18  ;;  %v431_v37 = vld [vmem:[#allocation6 + $0x310] sm:$0xff]  ;;  %v496_v41 = vadd.f32 %v432_v27, %v367_v23  ;;  %v267_v17 = vld [vmem:[#allocation6 + $0xa0] sm:$0xff]  ;;  %v264_v27 = vld [vmem:[#allocation6 + $0x88] sm:$0xff] }
  0x73   : > { %v1511_v47 = vpop.eup %1510  ;;  %831 = vmatprep.subr.mxu1 %v1509_v42  ;;  %1536 = vtanh.f32 %v511_v29  ;;  %v278_v29 = vld [vmem:[#allocation6 + $0xf8] sm:$0xff]  ;;  %v426_v42 = vld [vmem:[#allocation6 + $0x2e8] sm:$0xff]  ;;  %v493_v46 = vadd.f32 %v429_v32, %v364_v28  ;;  %v269_v22 = vld [vmem:[#allocation6 + $0xb0] sm:$0xff] }
  0x74   : > { %v1513_v52 = vpop.eup %1512  ;;  %671 = vmatpush1.msra.mxu0 %v1511_v47  ;;  %1538 = vtanh.f32 %v506_v33  ;;  %v366_v33 = vmul.f32 %v2095_v11, %v281_v19  ;;  %v428_v47 = vld [vmem:[#allocation6 + $0x2f8] sm:$0xff] }
  0x75   : > { %v1515_v57 = vpop.eup %1514  ;;  %832 = vmatpush1.msra.mxu1 %v1513_v52  ;;  %1540 = vtanh.f32 %v508_v38  ;;  %v361_v38 = vmul.f32 %v2093_v10, %v276_v24  ;;  %v425_v52 = vld [vmem:[#allocation6 + $0x2e0] sm:$0xff]  ;;  %v266_v32 = vld [vmem:[#allocation6 + $0x98] sm:$0xff] }
  0x76   : > { %v1517_v62 = vpop.eup %1516  ;;  %672 = vmatprep.subr.mxu0 %v1515_v57  ;;  %1542 = vtanh.f32 %v505_v43  ;;  %v363_v43 = vmul.f32 %v2097_v14, %v278_v29  ;;  %v495_v51 = vadd.f32 %v431_v37, %v366_v33  ;;  %v427_v57 = vld [vmem:[#allocation6 + $0x2f0] sm:$0xff]  ;;  %v263_v37 = vld [vmem:[#allocation6 + $0x80] sm:$0xff] }
  0x77   : > { %v1519_v6 = vpop.eup %1518  ;;  %833 = vmatprep.subr.mxu1 %v1517_v62  ;;  %1544 = vtanh.f32 %v507_v48  ;;  %v360_v48 = vmul.f32 %v2091_v9, %v275_v34  ;;  %v490_v56 = vadd.f32 %v426_v42, %v361_v38  ;;  %v422_v62 = vld [vmem:[#allocation6 + $0x2c8] sm:$0xff]  ;;  %v265_v42 = vld [vmem:[#allocation6 + $0x90] sm:$0xff] }
  0x78   : > { %v1521_v15 = vpop.eup %1520  ;;  %673 = vmatpush1.msra.mxu0 %v1519_v6  ;;  %1546 = vtanh.f32 %v502_v53  ;;  %v362_v53 = vmul.f32 %v2095_v11, %v277_v39  ;;  %v492_v61 = vadd.f32 %v428_v47, %v363_v43  ;;  %v424_v6 = vld [vmem:[#allocation6 + $0x2d8] sm:$0xff]  ;;  %v260_v47 = vld [vmem:[#allocation6 + $0x68] sm:$0xff] }
  0x79   : > { %v1523_v20 = vpop.eup %1522  ;;  %834 = vmatpush1.msra.mxu1 %v1521_v15  ;;  %1548 = vtanh.f32 %v504_v58  ;;  %v357_v58 = vmul.f32 %v2093_v10, %v272_v44  ;;  %v489_v5 = vadd.f32 %v425_v52, %v360_v48  ;;  %v421_v15 = vld [vmem:[#allocation6 + $0x2c0] sm:$0xff]  ;;  %v262_v52 = vld [vmem:[#allocation6 + $0x78] sm:$0xff] }
  0x7a   : > { %v1525_v25 = vpop.eup %1524  ;;  %674 = vmatprep.subr.mxu0 %v1523_v20  ;;  %1550 = vtanh.f32 %v501_v63  ;;  %v359_v63 = vmul.f32 %v2097_v14, %v274_v49  ;;  %v491_v13 = vadd.f32 %v427_v57, %v362_v53  ;;  %v423_v20 = vld [vmem:[#allocation6 + $0x2d0] sm:$0xff]  ;;  %v259_v57 = vld [vmem:[#allocation6 + $0x60] sm:$0xff] }
  0x7b   : > { %v1527_v30 = vpop.eup %1526  ;;  %835 = vmatprep.subr.mxu1 %v1525_v25  ;;  %1552 = vtanh.f32 %v503_v7  ;;  %v356_v7 = vmul.f32 %v2091_v9, %v271_v54  ;;  %v486_v19 = vadd.f32 %v422_v62, %v357_v58  ;;  %v418_v25 = vld [vmem:[#allocation6 + $0x2a8] sm:$0xff]  ;;  %v261_v62 = vld [vmem:[#allocation6 + $0x70] sm:$0xff] }
  0x7c   : > { %v1529_v35 = vpop.eup %1528  ;;  %675 = vmatpush1.msra.mxu0 %v1527_v30  ;;  %1554 = vtanh.f32 %v498_v16  ;;  %v358_v16 = vmul.f32 %v2095_v11, %v273_v59  ;;  %v488_v24 = vadd.f32 %v424_v6, %v359_v63  ;;  %v420_v30 = vld [vmem:[#allocation6 + $0x2b8] sm:$0xff]  ;;  %v256_v6 = vld [vmem:[#allocation6 + $0x48] sm:$0xff] }
  0x7d   : > { %v1531_v40 = vpop.eup %1530  ;;  %836 = vmatpush1.msra.mxu1 %v1529_v35  ;;  %1556 = vtanh.f32 %v500_v21  ;;  %v353_v21 = vmul.f32 %v2093_v10, %v268_v3  ;;  %v485_v29 = vadd.f32 %v421_v15, %v356_v7  ;;  %v417_v35 = vld [vmem:[#allocation6 + $0x2a0] sm:$0xff]  ;;  %v258_v15 = vld [vmem:[#allocation6 + $0x58] sm:$0xff] }
  0x7e   : > { %v1533_v45 = vpop.eup %1532  ;;  %676 = vmatprep.subr.mxu0 %v1531_v40  ;;  %1558 = vtanh.f32 %v497_v26  ;;  %v355_v26 = vmul.f32 %v2097_v14, %v270_v8  ;;  %v487_v34 = vadd.f32 %v423_v20, %v358_v16  ;;  %v419_v40 = vld [vmem:[#allocation6 + $0x2b0] sm:$0xff]  ;;  %v255_v20 = vld [vmem:[#allocation6 + $0x40] sm:$0xff] }
  0x7f   : > { %v1535_v50 = vpop.eup %1534  ;;  %837 = vmatprep.subr.mxu1 %v1533_v45  ;;  %1560 = vtanh.f32 %v499_v31  ;;  %v352_v31 = vmul.f32 %v2091_v9, %v267_v17  ;;  %v482_v39 = vadd.f32 %v418_v25, %v353_v21  ;;  %v414_v45 = vld [vmem:[#allocation6 + $0x288] sm:$0xff]  ;;  %v257_v25 = vld [vmem:[#allocation6 + $0x50] sm:$0xff] }
  0x80   : > { %v1537_v55 = vpop.eup %1536  ;;  %677 = vmatpush1.msra.mxu0 %v1535_v50  ;;  %1562 = vtanh.f32 %v494_v36  ;;  %v354_v36 = vmul.f32 %v2095_v11, %v269_v22  ;;  %v484_v44 = vadd.f32 %v420_v30, %v355_v26  ;;  %v416_v50 = vld [vmem:[#allocation6 + $0x298] sm:$0xff]  ;;  %v252_v30 = vld [vmem:[#allocation6 + $0x28] sm:$0xff] }
  0x81   : > { %v1539_v60 = vpop.eup %1538  ;;  %838 = vmatpush1.msra.mxu1 %v1537_v55  ;;  %1564 = vtanh.f32 %v496_v41  ;;  %v349_v41 = vmul.f32 %v2093_v10, %v264_v27  ;;  %v481_v49 = vadd.f32 %v417_v35, %v352_v31  ;;  %v413_v55 = vld [vmem:[#allocation6 + $0x280] sm:$0xff]  ;;  %v254_v35 = vld [vmem:[#allocation6 + $0x38] sm:$0xff] }
  0x82   : > { %v1541_v4 = vpop.eup %1540  ;;  %678 = vmatprep.subr.mxu0 %v1539_v60  ;;  %1566 = vtanh.f32 %v493_v46  ;;  %v351_v46 = vmul.f32 %v2097_v14, %v266_v32  ;;  %v483_v54 = vadd.f32 %v419_v40, %v354_v36  ;;  %v415_v60 = vld [vmem:[#allocation6 + $0x290] sm:$0xff]  ;;  %v251_v40 = vld [vmem:[#allocation6 + $0x20] sm:$0xff] }
  0x83   : > { %v1543_v12 = vpop.eup %1542  ;;  %839 = vmatprep.subr.mxu1 %v1541_v4  ;;  %1568 = vtanh.f32 %v495_v51  ;;  %v348_v51 = vmul.f32 %v2091_v9, %v263_v37  ;;  %v478_v59 = vadd.f32 %v414_v45, %v349_v41  ;;  %v410_v4 = vld [vmem:[#allocation6 + $0x268] sm:$0xff]  ;;  %v253_v45 = vld [vmem:[#allocation6 + $0x30] sm:$0xff] }
  0x84   : > { %v1545_v18 = vpop.eup %1544  ;;  %679 = vmatpush1.msra.mxu0 %v1543_v12  ;;  %1570 = vtanh.f32 %v490_v56  ;;  %v350_v56 = vmul.f32 %v2095_v11, %v265_v42  ;;  %v480_v3 = vadd.f32 %v416_v50, %v351_v46  ;;  %v412_v12 = vld [vmem:[#allocation6 + $0x278] sm:$0xff]  ;;  %v248_v50 = vld [vmem:[#allocation6 + $0x8] sm:$0xff] }
  0x85   : > { %v1547_v23 = vpop.eup %1546  ;;  %840 = vmatpush1.msra.mxu1 %v1545_v18  ;;  %1572 = vtanh.f32 %v492_v61  ;;  %v345_v61 = vmul.f32 %v2093_v10, %v260_v47  ;;  %v477_v8 = vadd.f32 %v413_v55, %v348_v51  ;;  %v409_v18 = vld [vmem:[#allocation6 + $0x260] sm:$0xff]  ;;  %v250_v55 = vld [vmem:[#allocation6 + $0x18] sm:$0xff] }
  0x86   : > { %v1549_v28 = vpop.eup %1548  ;;  %680 = vmatprep.subr.mxu0 %v1547_v23  ;;  %1574 = vtanh.f32 %v489_v5  ;;  %v347_v5 = vmul.f32 %v2097_v14, %v262_v52  ;;  %v479_v17 = vadd.f32 %v415_v60, %v350_v56  ;;  %v411_v23 = vld [vmem:[#allocation6 + $0x270] sm:$0xff]  ;;  %v247_v60 = vld [vmem:[#allocation6] sm:$0xff] }
  0x87   : > { %v1551_v33 = vpop.eup %1550  ;;  %841 = vmatprep.subr.mxu1 %v1549_v28  ;;  %1576 = vtanh.f32 %v491_v13  ;;  %v344_v13 = vmul.f32 %v2091_v9, %v259_v57  ;;  %v474_v22 = vadd.f32 %v410_v4, %v345_v61  ;;  %v406_v28 = vld [vmem:[#allocation6 + $0x248] sm:$0xff]  ;;  %v249_v4 = vld [vmem:[#allocation6 + $0x10] sm:$0xff] }
  0x88   : > { %v1553_v38 = vpop.eup %1552  ;;  %681 = vmatpush1.msra.mxu0 %v1551_v33  ;;  %1578 = vtanh.f32 %v486_v19  ;;  %v346_v19 = vmul.f32 %v2095_v11, %v261_v62  ;;  %v476_v27 = vadd.f32 %v412_v12, %v347_v5  ;;  %v408_v33 = vld [vmem:[#allocation6 + $0x258] sm:$0xff] }
  0x89   : > { %v1555_v43 = vpop.eup %1554  ;;  %842 = vmatpush1.msra.mxu1 %v1553_v38  ;;  %1580 = vtanh.f32 %v488_v24  ;;  %v341_v24 = vmul.f32 %v2093_v10, %v256_v6  ;;  %v473_v32 = vadd.f32 %v409_v18, %v344_v13  ;;  %v405_v38 = vld [vmem:[#allocation6 + $0x240] sm:$0xff] }
  0x8a   : > { %v1557_v48 = vpop.eup %1556  ;;  %682 = vmatprep.subr.mxu0 %v1555_v43  ;;  %1582 = vtanh.f32 %v485_v29  ;;  %v343_v29 = vmul.f32 %v2097_v14, %v258_v15  ;;  %v475_v37 = vadd.f32 %v411_v23, %v346_v19  ;;  %v407_v43 = vld [vmem:[#allocation6 + $0x250] sm:$0xff]  ;;  %v400_v15 = vld [vmem:[#allocation6 + $0x218] sm:$0xff]  ;;  %v334_v19 = vmul.f32 %v2095_v11, %v249_v4 }
  0x8b   : > { %v1559_v53 = vpop.eup %1558  ;;  %843 = vmatprep.subr.mxu1 %v1557_v48  ;;  %1584 = vtanh.f32 %v487_v34  ;;  %v340_v34 = vmul.f32 %v2091_v9, %v255_v20  ;;  %v470_v42 = vadd.f32 %v406_v28, %v341_v24  ;;  %v402_v48 = vld [vmem:[#allocation6 + $0x228] sm:$0xff]  ;;  %v609_v4 = vld [vmem:[#allocation6 + $0x418] sm:$0xff] }
  0x8c   : > { %v1561_v58 = vpop.eup %1560  ;;  %683 = vmatpush1.msra.mxu0 %v1559_v53  ;;  %1586 = vtanh.f32 %v482_v39  ;;  %v342_v39 = vmul.f32 %v2095_v11, %v257_v25  ;;  %v472_v47 = vadd.f32 %v408_v33, %v343_v29  ;;  %v404_v53 = vld [vmem:[#allocation6 + $0x238] sm:$0xff] }
  0x8d   : > { %v1563_v63 = vpop.eup %1562  ;;  %844 = vmatpush1.msra.mxu1 %v1561_v58  ;;  %1588 = vtanh.f32 %v484_v44  ;;  %v337_v44 = vmul.f32 %v2093_v10, %v252_v30  ;;  %v469_v52 = vadd.f32 %v405_v38, %v340_v34  ;;  %v401_v58 = vld [vmem:[#allocation6 + $0x220] sm:$0xff] }
  0x8e   : > { %v1565_v7 = vpop.eup %1564  ;;  %684 = vmatprep.subr.mxu0 %v1563_v63  ;;  %1590 = vtanh.f32 %v481_v49  ;;  %v339_v49 = vmul.f32 %v2097_v14, %v254_v35  ;;  %v471_v57 = vadd.f32 %v407_v43, %v342_v39  ;;  %v403_v63 = vld [vmem:[#allocation6 + $0x230] sm:$0xff] }
  0x8f   : > { %v1567_v16 = vpop.eup %1566  ;;  %845 = vmatprep.subr.mxu1 %v1565_v7  ;;  %1592 = vtanh.f32 %v483_v54  ;;  %v336_v54 = vmul.f32 %v2091_v9, %v251_v40  ;;  %v466_v62 = vadd.f32 %v402_v48, %v337_v44  ;;  %v398_v7 = vld [vmem:[#allocation6 + $0x208] sm:$0xff] }
  0x90   : > { %v1569_v21 = vpop.eup %1568  ;;  %685 = vmatpush1.msra.mxu0 %v1567_v16  ;;  %1594 = vtanh.f32 %v478_v59  ;;  %v338_v59 = vmul.f32 %v2095_v11, %v253_v45  ;;  %v468_v6 = vadd.f32 %v404_v53, %v339_v49  ;;  %v332_v16 = vmul.f32 %v2091_v9, %v247_v60  ;;  %v590_v44 = vld [vmem:[#allocation8 + $0x8] sm:$0xff]  ;;  %v591_v45 = vld [vmem:[#allocation8 + $0x10] sm:$0xff] }
  0x91   : > { %v1571_v26 = vpop.eup %1570  ;;  %846 = vmatpush1.msra.mxu1 %v1569_v21  ;;  %1596 = vtanh.f32 %v480_v3  ;;  %v333_v3 = vmul.f32 %v2093_v10, %v248_v50  ;;  %v465_v13 = vadd.f32 %v401_v58, %v336_v54  ;;  %v397_v10 = vld [vmem:[#allocation6 + $0x200] sm:$0xff]  ;;  %v594_v48 = vld [vmem:[#allocation8 + $0x28] sm:$0xff]  ;;  %v595_v49 = vld [vmem:[#allocation8 + $0x30] sm:$0xff] }
  0x92   : > { %v1573_v31 = vpop.eup %1572  ;;  %686 = vmatprep.subr.mxu0 %v1571_v26  ;;  %1598 = vtanh.f32 %v477_v8  ;;  %v335_v8 = vmul.f32 %v2097_v14, %v250_v55  ;;  %v467_v18 = vadd.f32 %v403_v63, %v338_v59  ;;  %v461_v9 = vadd.f32 %v397_v10, %v332_v16  ;;  %v596_v50 = vld [vmem:[#allocation8 + $0x38] sm:$0xff]  ;;  %v599_v53 = vld [vmem:[#allocation8 + $0x50] sm:$0xff]  ;;  %v601_v55 = vld [vmem:[#allocation8 + $0x60] sm:$0xff] }
  0x93   : > { %v1575_v36 = vpop.eup %1574  ;;  %847 = vmatprep.subr.mxu1 %v1573_v31  ;;  %1600 = vtanh.f32 %v479_v17  ;;  %v462_v21 = vadd.f32 %v398_v7, %v333_v3  ;;  %v600_v54 = vld [vmem:[#allocation8 + $0x58] sm:$0xff]  ;;  %v606_v59 = vld [vmem:[#allocation6 + $0x400] sm:$0xff]  ;;  %v608_v60 = vld [vmem:[#allocation6 + $0x410] sm:$0xff] }
  0x94   : > { %v1577_v41 = vpop.eup %1576  ;;  %687 = vmatpush1.msra.mxu0 %v1575_v36  ;;  %1602 = vtanh.f32 %v474_v22  ;;  %v399_v22 = vld [vmem:[#allocation6 + $0x210] sm:$0xff]  ;;  %v464_v23 = vadd.f32 %v400_v15, %v335_v8  ;;  %v604_v58 = vld [vmem:[#allocation8 + $0x78] sm:$0xff]  ;;  %v610_v7 = vld [vmem:[#allocation6 + $0x420] sm:$0xff] }
  0x95   : > { %v1579_v46 = vpop.eup %1578  ;;  %848 = vmatpush1.msra.mxu1 %v1577_v41  ;;  %1604 = vtanh.f32 %v476_v27  ;;  %v463_v26 = vadd.f32 %v399_v22, %v334_v19  ;;  %v589_v41 = vld [vmem:[#allocation8] sm:$0xff]  ;;  %v613_v10 = vld [vmem:[#allocation6 + $0x438] sm:$0xff] }
  0x96   : > { %v1581_v51 = vpop.eup %1580  ;;  %688 = vmatprep.subr.mxu0 %v1579_v46  ;;  %1606 = vtanh.f32 %v473_v32  ;;  %v592_v46 = vld [vmem:[#allocation8 + $0x18] sm:$0xff] }
  0x97   : > { %v1583_v56 = vpop.eup %1582  ;;  %849 = vmatprep.subr.mxu1 %v1581_v51  ;;  %1608 = vtanh.f32 %v475_v37  ;;  %v597_v51 = vld [vmem:[#allocation8 + $0x40] sm:$0xff] }
  0x98   : > { %v1585_v61 = vpop.eup %1584  ;;  %689 = vmatpush1.msra.mxu0 %v1583_v56  ;;  %1610 = vtanh.f32 %v470_v42  ;;  %v602_v56 = vld [vmem:[#allocation8 + $0x68] sm:$0xff] }
  0x99   : > { %v1587_v5 = vpop.eup %1586  ;;  %850 = vmatpush1.msra.mxu1 %v1585_v61  ;;  %1612 = vtanh.f32 %v472_v47  ;;  %v593_v47 = vld [vmem:[#allocation8 + $0x20] sm:$0xff] }
  0x9a   : > { %v1589_v12 = vpop.eup %1588  ;;  %690 = vmatprep.subr.mxu0 %v1587_v5  ;;  %1614 = vtanh.f32 %v469_v52  ;;  %v598_v52 = vld [vmem:[#allocation8 + $0x48] sm:$0xff] }
  0x9b   : > { %v1591_v17 = vpop.eup %1590  ;;  %851 = vmatprep.subr.mxu1 %v1589_v12  ;;  %1616 = vtanh.f32 %v471_v57  ;;  %v603_v57 = vld [vmem:[#allocation8 + $0x70] sm:$0xff] }
  0x9c   : > { %v1593_v20 = vpop.eup %1592  ;;  %691 = vmatpush1.msra.mxu0 %v1591_v17  ;;  %1618 = vtanh.f32 %v466_v62  ;;  %v607_v62 = vld [vmem:[#allocation6 + $0x408] sm:$0xff] }
  0x9d   : > { %v1595_v14 = vpop.eup %1594  ;;  %852 = vmatpush1.msra.mxu1 %v1593_v20  ;;  %1620 = vtanh.f32 %v468_v6 }
  0x9e   : > { %v1597_v24 = vpop.eup %1596  ;;  %692 = vmatprep.subr.mxu0 %v1595_v14  ;;  %1622 = vtanh.f32 %v465_v13  ;;  %v612_v13 = vld [vmem:[#allocation6 + $0x430] sm:$0xff] }
  0x9f   : > { %v1599_v25 = vpop.eup %1598  ;;  %853 = vmatprep.subr.mxu1 %v1597_v24  ;;  %1624 = vtanh.f32 %v467_v18 }
  0xa0   : > { %v1601_v27 = vpop.eup %1600  ;;  %693 = vmatpush1.msra.mxu0 %v1599_v25  ;;  %1626 = vtanh.f32 %v462_v21  ;;  %v614_v21 = vld [vmem:[#allocation6 + $0x440] sm:$0xff]  ;;  %v615_v25 = vld [vmem:[#allocation6 + $0x448] sm:$0xff] }
  0xa1   : > { %v1603_v11 = vpop.eup %1602  ;;  %854 = vmatpush1.msra.mxu1 %v1601_v27  ;;  %1628 = vtanh.f32 %v464_v23  ;;  %v616_v23 = vld [vmem:[#allocation6 + $0x450] sm:$0xff] }
  0xa2   : > { %v1605_v28 = vpop.eup %1604  ;;  %694 = vmatprep.subr.mxu0 %v1603_v11  ;;  %1630 = vtanh.f32 %v461_v9  ;;  %v617_v11 = vld [vmem:[#allocation6 + $0x458] sm:$0xff] }
  0xa3   : > { %v1607_v29 = vpop.eup %1606  ;;  %855 = vmatprep.subr.mxu1 %v1605_v28  ;;  %1632 = vtanh.f32 %v463_v26 }
  0xa4   : > { %v1609_v30 = vpop.eup %1608  ;;  %695 = vmatpush1.msra.mxu0 %v1607_v29 }
  0xa5   : > { %v1611_v31 = vpop.eup %1610  ;;  %856 = vmatpush1.msra.mxu1 %v1609_v30  ;;  %v618_v30 = vld [vmem:[#allocation6 + $0x460] sm:$0xff] }
  0xa6   : > { %v1613_v32 = vpop.eup %1612  ;;  %696 = vmatprep.subr.mxu0 %v1611_v31 }
  0xa7   : > { %v1615_v33 = vpop.eup %1614  ;;  %857 = vmatprep.subr.mxu1 %v1613_v32 }
  0xa8   : > { %v1617_v34 = vpop.eup %1616  ;;  %697 = vmatpush1.msra.mxu0 %v1615_v33  ;;  %v620_v33 = vld [vmem:[#allocation6 + $0x470] sm:$0xff] }
  0xa9   : > { %v1619_v35 = vpop.eup %1618  ;;  %858 = vmatpush1.msra.mxu1 %v1617_v34 }
  0xaa   : > { %v1621_v36 = vpop.eup %1620  ;;  %698 = vmatprep.subr.mxu0 %v1619_v35 }
  0xab   : > { %v1623_v37 = vpop.eup %1622  ;;  %859 = vmatprep.subr.mxu1 %v1621_v36  ;;  %v619_v36 = vld [vmem:[#allocation6 + $0x468] sm:$0xff] }
  0xac   : > { %v1625_v38 = vpop.eup %1624  ;;  %699 = vmatpush1.msra.mxu0 %v1623_v37 }
  0xad   : > { %v1627_v39 = vpop.eup %1626  ;;  %860 = vmatpush1.msra.mxu1 %v1625_v38 }
  0xae   : > { %v1629_v40 = vpop.eup %1628  ;;  %700 = vmatprep.subr.mxu0 %v1627_v39  ;;  %v621_v39 = vld [vmem:[#allocation6 + $0x478] sm:$0xff] }
  0xaf   : > { %v1631_v42 = vpop.eup %1630  ;;  %861 = vmatprep.subr.mxu1 %v1629_v40 }
  0xb0   : > { %v1633_v43 = vpop.eup %1632  ;;  %701 = vmatpush1.msra.mxu0 %v1631_v42  ;;  %v622_v42 = vld [vmem:[#allocation6 + $0x480] sm:$0xff] }
  0xb1   : > { %862 = vmatpush1.msra.mxu1 %v1633_v43  ;;  %735 = vmatmul.mubr.f32.vlgmr.msra.gmra.mxu0 %v589_v41 }
  0xb2   : > { %896 = vmatmul.mubr.f32.vlgmr.msra.gmra.mxu1 %v589_v41  ;;  %740 = vmatprep.mubr.f32.mxu0 %v1919_v1 }
  0xb3   : > { %901 = vmatprep.mubr.f32.mxu1 %v1919_v1 }
  0xb5   : > { %741 = vmatmul.mubr.f32.gmra.mxu0 %v590_v44 }
  0xb6   : > { %902 = vmatmul.mubr.f32.gmra.mxu1 %v590_v44  ;;  %746 = vmatprep.mubr.f32.mxu0 %v1919_v1 }
  0xb7   : > { %907 = vmatprep.mubr.f32.mxu1 %v1919_v1 }
  0xb9   : > { %747 = vmatmul.mubr.f32.gmra.mxu0 %v591_v45 }
  0xba   : > { %908 = vmatmul.mubr.f32.gmra.mxu1 %v591_v45  ;;  %752 = vmatprep.mubr.f32.mxu0 %v1919_v1  ;;  %v624_v45 = vld [vmem:[#allocation6 + $0x490] sm:$0xff] }
  0xbb   : > { %913 = vmatprep.mubr.f32.mxu1 %v1919_v1 }
  0xbd   : > { %753 = vmatmul.mubr.f32.gmra.mxu0 %v592_v46 }
  0xbe   : > { %914 = vmatmul.mubr.f32.gmra.mxu1 %v592_v46  ;;  %758 = vmatprep.mubr.f32.mxu0 %v1919_v1 }
  0xbf   : > { %919 = vmatprep.mubr.f32.mxu1 %v1919_v1 }
  0xc1   : > { %759 = vmatmul.mubr.f32.gmra.mxu0 %v593_v47 }
  0xc2   : > { %920 = vmatmul.mubr.f32.gmra.mxu1 %v593_v47  ;;  %764 = vmatprep.mubr.f32.mxu0 %v1919_v1 }
  0xc3   : > { %925 = vmatprep.mubr.f32.mxu1 %v1919_v1 }
  0xc5   : > { %765 = vmatmul.mubr.f32.gmra.mxu0 %v594_v48 }
  0xc6   : > { %926 = vmatmul.mubr.f32.gmra.mxu1 %v594_v48  ;;  %770 = vmatprep.mubr.f32.mxu0 %v1919_v1 }
  0xc7   : > { %931 = vmatprep.mubr.f32.mxu1 %v1919_v1 }
  0xc9   : > { %771 = vmatmul.mubr.f32.gmra.mxu0 %v595_v49 }
  0xca   : > { %932 = vmatmul.mubr.f32.gmra.mxu1 %v595_v49  ;;  %776 = vmatprep.mubr.f32.mxu0 %v1919_v1  ;;  %v623_v49 = vld [vmem:[#allocation6 + $0x488] sm:$0xff] }
  0xcb   : > { %937 = vmatprep.mubr.f32.mxu1 %v1919_v1 }
  0xcd   : > { %777 = vmatmul.mubr.f32.gmra.mxu0 %v596_v50 }
  0xce   : > { %938 = vmatmul.mubr.f32.gmra.mxu1 %v596_v50  ;;  %782 = vmatprep.mubr.f32.mxu0 %v1919_v1 }
  0xcf   : > { %943 = vmatprep.mubr.f32.mxu1 %v1919_v1 }
  0xd1   : > { %783 = vmatmul.mubr.f32.gmra.mxu0 %v597_v51 }
  0xd2   : > { %944 = vmatmul.mubr.f32.gmra.mxu1 %v597_v51  ;;  %788 = vmatprep.mubr.f32.mxu0 %v1919_v1 }
  0xd3   : > { %949 = vmatprep.mubr.f32.mxu1 %v1919_v1 }
  0xd5   : > { %789 = vmatmul.mubr.f32.gmra.mxu0 %v598_v52 }
  0xd6   : > { %950 = vmatmul.mubr.f32.gmra.mxu1 %v598_v52  ;;  %794 = vmatprep.mubr.f32.mxu0 %v1919_v1 }
  0xd7   : > { %955 = vmatprep.mubr.f32.mxu1 %v1919_v1 }
  0xd9   : > { %795 = vmatmul.mubr.f32.gmra.mxu0 %v599_v53 }
  0xda   : > { %956 = vmatmul.mubr.f32.gmra.mxu1 %v599_v53  ;;  %800 = vmatprep.mubr.f32.mxu0 %v1919_v1  ;;  %v625_v53 = vld [vmem:[#allocation6 + $0x498] sm:$0xff] }
  0xdb   : > { %961 = vmatprep.mubr.f32.mxu1 %v1919_v1 }
  0xdd   : > { %801 = vmatmul.mubr.f32.gmra.mxu0 %v600_v54 }
  0xde   : > { %962 = vmatmul.mubr.f32.gmra.mxu1 %v600_v54  ;;  %806 = vmatprep.mubr.f32.mxu0 %v1919_v1 }
  0xdf   : > { %967 = vmatprep.mubr.f32.mxu1 %v1919_v1 }
  0xe1   : > { %807 = vmatmul.mubr.f32.gmra.mxu0 %v601_v55 }
  0xe2   : > { %968 = vmatmul.mubr.f32.gmra.mxu1 %v601_v55  ;;  %812 = vmatprep.mubr.f32.mxu0 %v1919_v1 }
  0xe3   : > { %973 = vmatprep.mubr.f32.mxu1 %v1919_v1 }
  0xe5   : > { %813 = vmatmul.mubr.f32.gmra.mxu0 %v602_v56 }
  0xe6   : > { %974 = vmatmul.mubr.f32.gmra.mxu1 %v602_v56  ;;  %818 = vmatprep.mubr.f32.mxu0 %v1919_v1 }
  0xe7   : > { %979 = vmatprep.mubr.f32.mxu1 %v1919_v1 }
  0xe9   : > { %819 = vmatmul.mubr.f32.gmra.mxu0 %v603_v57 }
  0xea   : > { %980 = vmatmul.mubr.f32.gmra.mxu1 %v603_v57  ;;  %824 = vmatprep.mubr.f32.mxu0 %v1919_v1  ;;  %v626_v57 = vld [vmem:[#allocation6 + $0x4a0] sm:$0xff] }
  0xeb   : > { %985 = vmatprep.mubr.f32.mxu1 %v1919_v1  ;;  %v611_v1 = vld [vmem:[#allocation6 + $0x428] sm:$0xff] }
  0xed   : > { %825 = vmatmul.mubr.f32.gmra.mxu0 %v604_v58 }
  0xee   : > { %986 = vmatmul.mubr.f32.gmra.mxu1 %v604_v58 }
 0x171   : > { %v736_v61 = vpop.f32.mrf.mxu0 }
 0x172   : > { %v737_v63 = vadd.f32 %v736_v61, %v606_v59  ;;  %v897_v3 = vpop.f32.mrf.mxu1  ;;  %v628_v61 = vld [vmem:[#allocation6 + $0x4b0] sm:$0xff] }
 0x173   : > { %v898_v5 = vadd.f32 %v897_v3, %v608_v60  ;;  %v738_v6 = vpop.f32.mrf.mxu0 }
 0x174   : > { %1634 = vtanh.f32 %v737_v63  ;;  %v739_v8 = vadd.f32 %v738_v6, %v607_v62  ;;  %v899_v12 = vpop.f32.mrf.mxu1 }
 0x175   : > { %1636 = vtanh.f32 %v898_v5  ;;  %v900_v15 = vadd.f32 %v899_v12, %v609_v4  ;;  %v742_v16 = vpop.f32.mrf.mxu0  ;;  %v627_v4 = vld [vmem:[#allocation6 + $0x4a8] sm:$0xff] }
 0x176   : > { %1638 = vtanh.f32 %v739_v8  ;;  %v743_v17 = vadd.f32 %v742_v16, %v610_v7  ;;  %v903_v18 = vpop.f32.mrf.mxu1  ;;  %v629_v8 = vld [vmem:[#allocation6 + $0x4b8] sm:$0xff]  ;;  %v630_v16 = vld [vmem:[#allocation6 + $0x4c0] sm:$0xff] }
 0x177   : > { %1640 = vtanh.f32 %v900_v15  ;;  %v904_v19 = vadd.f32 %v903_v18, %v612_v13  ;;  %v744_v20 = vpop.f32.mrf.mxu0 }
 0x178   : > { %1642 = vtanh.f32 %v743_v17  ;;  %v745_v22 = vadd.f32 %v744_v20, %v611_v1  ;;  %v905_v14 = vpop.f32.mrf.mxu1 }
 0x179   : > { %1644 = vtanh.f32 %v904_v19  ;;  %v906_v24 = vadd.f32 %v905_v14, %v613_v10  ;;  %v748_v9 = vpop.f32.mrf.mxu0  ;;  %v632_v10 = vld [vmem:[#allocation6 + $0x4d0] sm:$0xff] }
 0x17a   : > { %1646 = vtanh.f32 %v745_v22  ;;  %v749_v26 = vadd.f32 %v748_v9, %v614_v21  ;;  %v909_v27 = vpop.f32.mrf.mxu1  ;;  %v631_v22 = vld [vmem:[#allocation6 + $0x4c8] sm:$0xff]  ;;  %v633_v9 = vld [vmem:[#allocation6 + $0x4d8] sm:$0xff] }
 0x17b   : > { %1648 = vtanh.f32 %v906_v24  ;;  %v910_v28 = vadd.f32 %v909_v27, %v616_v23  ;;  %v750_v29 = vpop.f32.mrf.mxu0 }
 0x17c   : > { %1650 = vtanh.f32 %v749_v26  ;;  %v751_v31 = vadd.f32 %v750_v29, %v615_v25  ;;  %v911_v32 = vpop.f32.mrf.mxu1 }
 0x17d   : > { %1652 = vtanh.f32 %v910_v28  ;;  %v912_v34 = vadd.f32 %v911_v32, %v617_v11  ;;  %v754_v35 = vpop.f32.mrf.mxu0  ;;  %v634_v11 = vld [vmem:[#allocation6 + $0x4e0] sm:$0xff] }
 0x17e   : > { %1654 = vtanh.f32 %v751_v31  ;;  %v755_v37 = vadd.f32 %v754_v35, %v618_v30  ;;  %v915_v38 = vpop.f32.mrf.mxu1  ;;  %v636_v31 = vld [vmem:[#allocation6 + $0x4f0] sm:$0xff]  ;;  %v635_v35 = vld [vmem:[#allocation6 + $0x4e8] sm:$0xff] }
 0x17f   : > { %1656 = vtanh.f32 %v912_v34  ;;  %v916_v40 = vadd.f32 %v915_v38, %v620_v33  ;;  %v756_v41 = vpop.f32.mrf.mxu0  ;;  %v1063_v38 = vld [vmem:[#allocation6 + $0x630] sm:$0xff] }
 0x180   : > { %1658 = vtanh.f32 %v755_v37  ;;  %v757_v43 = vadd.f32 %v756_v41, %v619_v36  ;;  %v917_v44 = vpop.f32.mrf.mxu1  ;;  %v1061_v37 = vld [vmem:[#allocation6 + $0x620] sm:$0xff]  ;;  %v637_v41 = vld [vmem:[#allocation6 + $0x4f8] sm:$0xff] }
 0x181   : > { %v2193_v46 = vpop.eup %1634  ;;  %1660 = vtanh.f32 %v916_v40  ;;  %v918_v47 = vadd.f32 %v917_v44, %v621_v39  ;;  %v760_v48 = vpop.f32.mrf.mxu0  ;;  %v1062_v44 = vld [vmem:[#allocation6 + $0x628] sm:$0xff] }
 0x182   : > { %v2195_v50 = vpop.eup %1636  ;;  %1662 = vtanh.f32 %v757_v43  ;;  %v761_v51 = vadd.f32 %v760_v48, %v622_v42  ;;  %v921_v52 = vpop.f32.mrf.mxu1  ;;  %v1057_v43 = vld [vmem:[#allocation6 + $0x600] sm:$0xff] }
 0x183   : > { %v2197_v54 = vpop.eup %1638  ;;  %1664 = vtanh.f32 %v918_v47  ;;  %v922_v55 = vadd.f32 %v921_v52, %v624_v45  ;;  %v762_v56 = vpop.f32.mrf.mxu0  ;;  %v638_v48 = vld [vmem:[#allocation6 + $0x500] sm:$0xff]  ;;  %v1064_v52 = vld [vmem:[#allocation6 + $0x638] sm:$0xff] }
 0x184   : > { %v2199_v58 = vpop.eup %1640  ;;  %1666 = vtanh.f32 %v761_v51  ;;  %v763_v59 = vadd.f32 %v762_v56, %v623_v49  ;;  %v923_v60 = vpop.f32.mrf.mxu1  ;;  %v1059_v51 = vld [vmem:[#allocation6 + $0x610] sm:$0xff] }
 0x185   : > { %v2201_v62 = vpop.eup %1642  ;;  %1668 = vtanh.f32 %v922_v55  ;;  %v924_v63 = vadd.f32 %v923_v60, %v625_v53  ;;  %v766_v3 = vpop.f32.mrf.mxu0  ;;  %v640_v56 = vld [vmem:[#allocation6 + $0x510] sm:$0xff]  ;;  %v1060_v60 = vld [vmem:[#allocation6 + $0x618] sm:$0xff] }
 0x186   : > { %v2203_v5 = vpop.eup %1644  ;;  %1670 = vtanh.f32 %v763_v59  ;;  %v767_v6 = vadd.f32 %v766_v3, %v626_v57  ;;  %v927_v7 = vpop.f32.mrf.mxu1  ;;  %v1058_v59 = vld [vmem:[#allocation6 + $0x608] sm:$0xff] }
 0x187   : > { %v2205_v12 = vpop.eup %1646  ;;  %1672 = vtanh.f32 %v924_v63  ;;  %v928_v13 = vadd.f32 %v927_v7, %v628_v61  ;;  %v768_v15 = vpop.f32.mrf.mxu0  ;;  %v1125_v61 = vmul.f32 %v2201_v62, %v1061_v37  ;;  %v1127_v63 = vmul.f32 %v2203_v5, %v1063_v38  ;;  %v1069_v37 = vld [vmem:[#allocation6 + $0x660] sm:$0xff]  ;;  %v1071_v38 = vld [vmem:[#allocation6 + $0x670] sm:$0xff] }
 0x188   : > { %v2207_v1 = vpop.eup %1648  ;;  %1674 = vtanh.f32 %v767_v6  ;;  %v769_v17 = vadd.f32 %v768_v15, %v627_v4  ;;  %v929_v18 = vpop.f32.mrf.mxu1  ;;  %v639_v6 = vld [vmem:[#allocation6 + $0x508] sm:$0xff]  ;;  %v1123_v62 = vmul.f32 %v2195_v50, %v1059_v51 }
 0x189   : > { %v2209_v19 = vpop.eup %1650  ;;  %1676 = vtanh.f32 %v928_v13  ;;  %v930_v20 = vadd.f32 %v929_v18, %v629_v8  ;;  %v772_v21 = vpop.f32.mrf.mxu0  ;;  %v1121_v8 = vmul.f32 %v2193_v46, %v1057_v43  ;;  %v1126_v13 = vmul.f32 %v2205_v12, %v1062_v44 }
 0x18a   : > { %v2211_v14 = vpop.eup %1652  ;;  %1678 = vtanh.f32 %v769_v17  ;;  %v773_v23 = vadd.f32 %v772_v21, %v630_v16  ;;  %v933_v24 = vpop.f32.mrf.mxu1  ;;  %v641_v17 = vld [vmem:[#allocation6 + $0x518] sm:$0xff]  ;;  %v1128_v5 = vmul.f32 %v2207_v1, %v1064_v52  ;;  %v1122_v46 = vmul.f32 %v2197_v54, %v1058_v59  ;;  %v646_v52 = vld [vmem:[#allocation6 + $0x540] sm:$0xff] }
 0x18b   : > { %v2213_v25 = vpop.eup %1654  ;;  %1680 = vtanh.f32 %v930_v20  ;;  %v934_v26 = vadd.f32 %v933_v24, %v632_v10  ;;  %v774_v27 = vpop.f32.mrf.mxu0  ;;  %v1065_v10 = vld [vmem:[#allocation6 + $0x640] sm:$0xff]  ;;  %v1124_v12 = vmul.f32 %v2199_v58, %v1060_v60  ;;  %v1067_v24 = vld [vmem:[#allocation6 + $0x650] sm:$0xff]  ;;  %v1185_v50 = vadd.f32 %v1125_v61, %v1121_v8  ;;  %v647_v8 = vld [vmem:[#allocation6 + $0x548] sm:$0xff] }
 0x18c   : > { %v2215_v28 = vpop.eup %1656  ;;  %1682 = vtanh.f32 %v773_v23  ;;  %v775_v29 = vadd.f32 %v774_v27, %v631_v22  ;;  %v935_v30 = vpop.f32.mrf.mxu1  ;;  %v642_v22 = vld [vmem:[#allocation6 + $0x520] sm:$0xff]  ;;  %v644_v27 = vld [vmem:[#allocation6 + $0x530] sm:$0xff]  ;;  %v1227_v1 = vadd.f32 %v1127_v63, %v1123_v62  ;;  %v1206_v54 = vadd.f32 %v1126_v13, %v1122_v46 }
 0x18d   : > { %v2217_v32 = vpop.eup %1658  ;;  %1684 = vtanh.f32 %v934_v26  ;;  %v936_v33 = vadd.f32 %v935_v30, %v633_v9  ;;  %v778_v34 = vpop.f32.mrf.mxu0  ;;  %v1068_v30 = vld [vmem:[#allocation6 + $0x658] sm:$0xff]  ;;  %v1129_v58 = vmul.f32 %v2209_v19, %v1065_v10  ;;  %v1248_v44 = vadd.f32 %v1128_v5, %v1124_v12  ;;  %v648_v61 = vld [vmem:[#allocation6 + $0x550] sm:$0xff]  ;;  %v1073_v10 = vld [vmem:[#allocation6 + $0x680] sm:$0xff] }
 0x18e   : > { %v2219_v36 = vpop.eup %1660  ;;  %1686 = vtanh.f32 %v775_v29  ;;  %v779_v39 = vadd.f32 %v778_v34, %v634_v11  ;;  %v939_v40 = vpop.f32.mrf.mxu1  ;;  %v1066_v29 = vld [vmem:[#allocation6 + $0x648] sm:$0xff] }
 0x18f   : > { %v2221_v42 = vpop.eup %1662  ;;  %1688 = vtanh.f32 %v936_v33  ;;  %v940_v45 = vadd.f32 %v939_v40, %v636_v31  ;;  %v780_v47 = vpop.f32.mrf.mxu0  ;;  %v643_v34 = vld [vmem:[#allocation6 + $0x528] sm:$0xff]  ;;  %v1130_v19 = vmul.f32 %v2213_v25, %v1066_v29  ;;  %v1186_v25 = vadd.f32 %v1185_v50, %v1129_v58 }
 0x190   : > { %v2223_v49 = vpop.eup %1664  ;;  %1690 = vtanh.f32 %v779_v39  ;;  %v781_v53 = vadd.f32 %v780_v47, %v635_v35  ;;  %v941_v55 = vpop.f32.mrf.mxu1  ;;  %v1070_v47 = vld [vmem:[#allocation6 + $0x668] sm:$0xff] }
 0x191   : > { %v2225_v57 = vpop.eup %1666  ;;  %1692 = vtanh.f32 %v940_v45  ;;  %v942_v3 = vadd.f32 %v941_v55, %v637_v41  ;;  %v784_v4 = vpop.f32.mrf.mxu0  ;;  %v645_v41 = vld [vmem:[#allocation6 + $0x538] sm:$0xff]  ;;  %v1131_v45 = vmul.f32 %v2211_v14, %v1067_v24  ;;  %v1132_v55 = vmul.f32 %v2215_v28, %v1068_v30  ;;  %v1075_v24 = vld [vmem:[#allocation6 + $0x690] sm:$0xff]  ;;  %v1074_v29 = vld [vmem:[#allocation6 + $0x688] sm:$0xff] }
 0x192   : > { %v2229_v7 = vpop.eup %1668  ;;  %1694 = vtanh.f32 %v781_v53  ;;  %v785_v15 = vadd.f32 %v784_v4, %v638_v48  ;;  %v945_v16 = vpop.f32.mrf.mxu1  ;;  %v1133_v14 = vmul.f32 %v2217_v32, %v1069_v37  ;;  %v1134_v28 = vmul.f32 %v2221_v42, %v1070_v47  ;;  %v1077_v37 = vld [vmem:[#allocation6 + $0x6a0] sm:$0xff] }
 0x193   : > { %v2233_v18 = vpop.eup %1670  ;;  %1696 = vtanh.f32 %v942_v3  ;;  %v946_v20 = vadd.f32 %v945_v16, %v640_v56  ;;  %v786_v21 = vpop.f32.mrf.mxu0  ;;  %v1072_v56 = vld [vmem:[#allocation6 + $0x678] sm:$0xff]  ;;  %v1135_v3 = vmul.f32 %v2219_v36, %v1071_v38  ;;  %v1228_v5 = vadd.f32 %v1227_v1, %v1131_v45  ;;  %v1079_v38 = vld [vmem:[#allocation6 + $0x6b0] sm:$0xff] }
 0x194   : > { %v2237_v23 = vpop.eup %1672  ;;  %1698 = vtanh.f32 %v785_v15  ;;  %v787_v9 = vadd.f32 %v786_v21, %v639_v6  ;;  %v947_v26 = vpop.f32.mrf.mxu1  ;;  %v1136_v32 = vmul.f32 %v2223_v49, %v1072_v56  ;;  %v650_v21 = vld [vmem:[#allocation6 + $0x560] sm:$0xff]  ;;  %v1207_v46 = vadd.f32 %v1206_v54, %v1130_v19  ;;  %v1076_v49 = vld [vmem:[#allocation6 + $0x698] sm:$0xff] }
 0x195   : > { %v2241_v11 = vpop.eup %1674  ;;  %1700 = vtanh.f32 %v946_v20  ;;  %v948_v31 = vadd.f32 %v947_v26, %v641_v17  ;;  %v790_v33 = vpop.f32.mrf.mxu0  ;;  %v649_v17 = vld [vmem:[#allocation6 + $0x558] sm:$0xff]  ;;  %v1249_v12 = vadd.f32 %v1248_v44, %v1132_v55  ;;  %v652_v26 = vld [vmem:[#allocation6 + $0x570] sm:$0xff]  ;;  %v1187_v50 = vadd.f32 %v1186_v25, %v1133_v14  ;;  %v654_v19 = vld [vmem:[#allocation6 + $0x580] sm:$0xff] }
 0x196   : > { %v2243_v35 = vpop.eup %1676  ;;  %1702 = vtanh.f32 %v787_v9  ;;  %v791_v39 = vadd.f32 %v790_v33, %v642_v22  ;;  %v951_v40 = vpop.f32.mrf.mxu1  ;;  %v1229_v1 = vadd.f32 %v1228_v5, %v1135_v3  ;;  %v651_v33 = vld [vmem:[#allocation6 + $0x568] sm:$0xff]  ;;  %v1208_v58 = vadd.f32 %v1207_v46, %v1134_v28  ;;  %v656_v14 = vld [vmem:[#allocation6 + $0x590] sm:$0xff] }
 0x197   : > { %v2246_v43 = vpop.eup %1678  ;;  %1704 = vtanh.f32 %v948_v31  ;;  %v952_v48 = vadd.f32 %v951_v40, %v644_v27  ;;  %v792_v51 = vpop.f32.mrf.mxu0  ;;  %v1137_v54 = vmul.f32 %v2225_v57, %v1073_v10  ;;  %v1250_v45 = vadd.f32 %v1249_v12, %v1136_v32  ;;  %v655_v25 = vld [vmem:[#allocation6 + $0x588] sm:$0xff]  ;;  %v1081_v10 = vld [vmem:[#allocation6 + $0x6c0] sm:$0xff] }
 0x198   : > { %v2249_v53 = vpop.eup %1680  ;;  %1706 = vtanh.f32 %v791_v39  ;;  %v793_v59 = vadd.f32 %v792_v51, %v643_v34  ;;  %v953_v60 = vpop.f32.mrf.mxu1  ;;  %v1139_v47 = vmul.f32 %v2229_v7, %v1075_v24  ;;  %v1138_v57 = vmul.f32 %v2233_v18, %v1074_v29  ;;  %v1083_v24 = vld [vmem:[#allocation6 + $0x6d0] sm:$0xff]  ;;  %v1082_v29 = vld [vmem:[#allocation6 + $0x6c8] sm:$0xff] }
 0x199   : > { %v2253_v63 = vpop.eup %1682  ;;  %1708 = vtanh.f32 %v952_v48  ;;  %v954_v4 = vadd.f32 %v953_v60, %v645_v41  ;;  %v796_v6 = vpop.f32.mrf.mxu0  ;;  %v653_v41 = vld [vmem:[#allocation6 + $0x578] sm:$0xff]  ;;  %v1078_v48 = vld [vmem:[#allocation6 + $0x6a8] sm:$0xff]  ;;  %v1140_v56 = vmul.f32 %v2237_v23, %v1076_v49  ;;  %v1141_v7 = vmul.f32 %v2241_v11, %v1077_v37  ;;  %v1085_v37 = vld [vmem:[#allocation6 + $0x6e0] sm:$0xff] }
 0x19a   : > { %v2257_v13 = vpop.eup %1684  ;;  %1710 = vtanh.f32 %v793_v59  ;;  %v797_v15 = vadd.f32 %v796_v6, %v646_v52  ;;  %v957_v16 = vpop.f32.mrf.mxu1  ;;  %v1080_v59 = vld [vmem:[#allocation6 + $0x6b8] sm:$0xff]  ;;  %v1188_v18 = vadd.f32 %v1187_v50, %v1137_v54  ;;  %v1142_v23 = vmul.f32 %v2246_v43, %v1078_v48 }
 0x19b   : > { %v2260_v62 = vpop.eup %1686  ;;  %1712 = vtanh.f32 %v954_v4  ;;  %v958_v36 = vadd.f32 %v957_v16, %v648_v61  ;;  %v798_v20 = vpop.f32.mrf.mxu0  ;;  %v1143_v4 = vmul.f32 %v2243_v35, %v1079_v38  ;;  %v1230_v32 = vadd.f32 %v1229_v1, %v1139_v47  ;;  %v1087_v38 = vld [vmem:[#allocation6 + $0x6f0] sm:$0xff] }
 0x19c   : > { %v2263_v22 = vpop.eup %1688  ;;  %1714 = vtanh.f32 %v797_v15  ;;  %v799_v42 = vadd.f32 %v798_v20, %v647_v8  ;;  %v959_v9 = vpop.f32.mrf.mxu1  ;;  %v1144_v11 = vmul.f32 %v2249_v53, %v1080_v59  ;;  %v658_v20 = vld [vmem:[#allocation6 + $0x5a0] sm:$0xff]  ;;  %v1209_v46 = vadd.f32 %v1208_v58, %v1138_v57  ;;  %v1084_v53 = vld [vmem:[#allocation6 + $0x6d8] sm:$0xff] }
 0x19d   : > { %v2265_v27 = vpop.eup %1690  ;;  %1716 = vtanh.f32 %v958_v36  ;;  %v960_v30 = vadd.f32 %v959_v9, %v649_v17  ;;  %v802_v31 = vpop.f32.mrf.mxu0  ;;  %v657_v17 = vld [vmem:[#allocation6 + $0x598] sm:$0xff]  ;;  %v1251_v12 = vadd.f32 %v1250_v45, %v1140_v56  ;;  %v660_v9 = vld [vmem:[#allocation6 + $0x5b0] sm:$0xff]  ;;  %v1189_v50 = vadd.f32 %v1188_v18, %v1141_v7  ;;  %v662_v57 = vld [vmem:[#allocation6 + $0x5c0] sm:$0xff] }
 0x19e   : > { %v2267_v34 = vpop.eup %1692  ;;  %1718 = vtanh.f32 %v799_v42  ;;  %v803_v39 = vadd.f32 %v802_v31, %v650_v21  ;;  %v963_v40 = vpop.f32.mrf.mxu1  ;;  %v1231_v1 = vadd.f32 %v1230_v32, %v1143_v4  ;;  %v659_v31 = vld [vmem:[#allocation6 + $0x5a8] sm:$0xff]  ;;  %v1210_v54 = vadd.f32 %v1209_v46, %v1142_v23  ;;  %v664_v7 = vld [vmem:[#allocation6 + $0x5d0] sm:$0xff] }
 0x19f   : > { %v2270_v44 = vpop.eup %1694  ;;  %1720 = vtanh.f32 %v960_v30  ;;  %v964_v51 = vadd.f32 %v963_v40, %v652_v26  ;;  %v804_v52 = vpop.f32.mrf.mxu0  ;;  %v1145_v58 = vmul.f32 %v2253_v63, %v1081_v10  ;;  %v1252_v47 = vadd.f32 %v1251_v12, %v1144_v11  ;;  %v663_v18 = vld [vmem:[#allocation6 + $0x5c8] sm:$0xff]  ;;  %v1089_v10 = vld [vmem:[#allocation6 + $0x700] sm:$0xff] }
 0x1a0   : > { %v2273_v55 = vpop.eup %1696  ;;  %1722 = vtanh.f32 %v803_v39  ;;  %v805_v60 = vadd.f32 %v804_v52, %v651_v33  ;;  %v965_v61 = vpop.f32.mrf.mxu1  ;;  %v1147_v48 = vmul.f32 %v2257_v13, %v1083_v24  ;;  %v1146_v63 = vmul.f32 %v2260_v62, %v1082_v29  ;;  %v1091_v24 = vld [vmem:[#allocation6 + $0x710] sm:$0xff] }
 0x1a1   : > { %v2277_v3 = vpop.eup %1698  ;;  %1724 = vtanh.f32 %v964_v51  ;;  %v966_v6 = vadd.f32 %v965_v61, %v653_v41  ;;  %v808_v8 = vpop.f32.mrf.mxu0  ;;  %v661_v41 = vld [vmem:[#allocation6 + $0x5b8] sm:$0xff]  ;;  %v1086_v51 = vld [vmem:[#allocation6 + $0x6e8] sm:$0xff]  ;;  %v1148_v59 = vmul.f32 %v2263_v22, %v1084_v53  ;;  %v1149_v13 = vmul.f32 %v2265_v27, %v1085_v37  ;;  %v1093_v53 = vld [vmem:[#allocation6 + $0x720] sm:$0xff] }
 0x1a2   : > { %v2281_v28 = vpop.eup %1700  ;;  %1726 = vtanh.f32 %v805_v60  ;;  %v809_v15 = vadd.f32 %v808_v8, %v654_v19  ;;  %v969_v16 = vpop.f32.mrf.mxu1  ;;  %v1088_v60 = vld [vmem:[#allocation6 + $0x6f8] sm:$0xff]  ;;  %v1190_v62 = vadd.f32 %v1189_v50, %v1145_v58  ;;  %v1150_v22 = vmul.f32 %v2270_v44, %v1086_v51 }
 0x1a3   : > { %v2284_v5 = vpop.eup %1702  ;;  %1728 = vtanh.f32 %v966_v6  ;;  %v970_v35 = vadd.f32 %v969_v16, %v656_v14  ;;  %v810_v36 = vpop.f32.mrf.mxu0  ;;  %v1151_v6 = vmul.f32 %v2267_v34, %v1087_v38  ;;  %v1232_v11 = vadd.f32 %v1231_v1, %v1147_v48  ;;  %v1090_v1 = vld [vmem:[#allocation6 + $0x708] sm:$0xff]  ;;  %v1095_v38 = vld [vmem:[#allocation6 + $0x730] sm:$0xff] }
 0x1a4   : > { %v2287_v21 = vpop.eup %1704  ;;  %1730 = vtanh.f32 %v809_v15  ;;  %v811_v43 = vadd.f32 %v810_v36, %v655_v25  ;;  %v971_v42 = vpop.f32.mrf.mxu1  ;;  %v1152_v27 = vmul.f32 %v2273_v55, %v1088_v60  ;;  %v666_v36 = vld [vmem:[#allocation6 + $0x5e0] sm:$0xff]  ;;  %v1211_v46 = vadd.f32 %v1210_v54, %v1146_v63  ;;  %v1092_v54 = vld [vmem:[#allocation6 + $0x718] sm:$0xff] }
 0x1a5   : > { %v2289_v26 = vpop.eup %1706  ;;  %1732 = vtanh.f32 %v970_v35  ;;  %v972_v49 = vadd.f32 %v971_v42, %v657_v17  ;;  %v814_v30 = vpop.f32.mrf.mxu0  ;;  %v665_v17 = vld [vmem:[#allocation6 + $0x5d8] sm:$0xff]  ;;  %v1253_v12 = vadd.f32 %v1252_v47, %v1148_v59  ;;  %v668_v42 = vld [vmem:[#allocation6 + $0x5f0] sm:$0xff]  ;;  %v1191_v50 = vadd.f32 %v1190_v62, %v1149_v13 }
 0x1a6   : > { %v2291_v33 = vpop.eup %1708  ;;  %1734 = vtanh.f32 %v811_v43  ;;  %v815_v39 = vadd.f32 %v814_v30, %v658_v20  ;;  %v975_v40 = vpop.f32.mrf.mxu1  ;;  %v1233_v29 = vadd.f32 %v1232_v11, %v1151_v6  ;;  %v667_v30 = vld [vmem:[#allocation6 + $0x5e8] sm:$0xff]  ;;  %v1212_v58 = vadd.f32 %v1211_v46, %v1150_v22 }
 0x1a7   : > { %v2294_v45 = vpop.eup %1710  ;;  %1736 = vtanh.f32 %v972_v49  ;;  %v976_v52 = vadd.f32 %v975_v40, %v660_v9  ;;  %v816_v19 = vpop.f32.mrf.mxu0  ;;  %v1153_v37 = vmul.f32 %v2277_v3, %v1089_v10  ;;  %v1254_v48 = vadd.f32 %v1253_v12, %v1152_v27 }
 0x1a8   : > { %v2297_v56 = vpop.eup %1712  ;;  %1738 = vtanh.f32 %v815_v39  ;;  %v817_v61 = vadd.f32 %v816_v19, %v659_v31  ;;  %v977_v14 = vpop.f32.mrf.mxu1  ;;  %v1155_v51 = vmul.f32 %v2281_v28, %v1091_v24  ;;  %v1097_v19 = vld [vmem:[#allocation6 + $0x740] sm:$0xff]  ;;  %v1154_v60 = vmul.f32 %v2284_v5, %v1090_v1  ;;  %v1104_v24 = vld [vmem:[#allocation6 + $0x778] sm:$0xff] }
 0x1a9   : > { %v2301_v4 = vpop.eup %1714  ;;  %1740 = vtanh.f32 %v976_v52  ;;  %v978_v8 = vadd.f32 %v977_v14, %v661_v41  ;;  %v820_v25 = vpop.f32.mrf.mxu0  ;;  %v669_v41 = vld [vmem:[#allocation6 + $0x5f8] sm:$0xff]  ;;  %v1094_v52 = vld [vmem:[#allocation6 + $0x728] sm:$0xff]  ;;  %v1157_v3 = vmul.f32 %v2289_v26, %v1093_v53  ;;  %v1099_v14 = vld [vmem:[#allocation6 + $0x750] sm:$0xff]  ;;  %v1159_v28 = vmul.f32 %v2291_v33, %v1095_v38 }
 0x1aa   : > { %v2305_v23 = vpop.eup %1716  ;;  %1742 = vtanh.f32 %v817_v61  ;;  %v821_v15 = vadd.f32 %v820_v25, %v662_v57  ;;  %v981_v16 = vpop.f32.mrf.mxu1  ;;  %v1096_v61 = vld [vmem:[#allocation6 + $0x738] sm:$0xff]  ;;  %v1098_v25 = vld [vmem:[#allocation6 + $0x748] sm:$0xff]  ;;  %v1158_v5 = vmul.f32 %v2294_v45, %v1094_v52  ;;  %v1161_v26 = vmul.f32 %v2301_v4, %v1097_v19  ;;  %v1107_v4 = vld [vmem:[#allocation6 + $0x790] sm:$0xff] }
 0x1ab   : > { %v2308_v32 = vpop.eup %1718  ;;  %1744 = vtanh.f32 %v978_v8  ;;  %v982_v34 = vadd.f32 %v981_v16, %v664_v7  ;;  %v822_v35 = vpop.f32.mrf.mxu0  ;;  %v1156_v8 = vmul.f32 %v2287_v21, %v1092_v54  ;;  %v1100_v16 = vld [vmem:[#allocation6 + $0x758] sm:$0xff]  ;;  %v1234_v27 = vadd.f32 %v1233_v29, %v1155_v51  ;;  %v1102_v33 = vld [vmem:[#allocation6 + $0x768] sm:$0xff]  ;;  %v1109_v1 = vld [vmem:[#allocation6 + $0x7a0] sm:$0xff] }
 0x1ac   : > { %v2311_v20 = vpop.eup %1720  ;;  %1746 = vtanh.f32 %v821_v15  ;;  %v823_v44 = vadd.f32 %v822_v35, %v663_v18  ;;  %v983_v43 = vpop.f32.mrf.mxu1  ;;  %v1101_v18 = vld [vmem:[#allocation6 + $0x760] sm:$0xff]  ;;  %v1192_v15 = vadd.f32 %v1191_v50, %v1153_v37  ;;  %v1160_v10 = vmul.f32 %v2297_v56, %v1096_v61  ;;  %v1106_v56 = vld [vmem:[#allocation6 + $0x788] sm:$0xff]  ;;  %v1111_v37 = vld [vmem:[#allocation6 + $0x7b0] sm:$0xff] }
 0x1ad   : > { %v1723_v9 = vpop.eup %1722  ;;  %1748 = vtanh.f32 %v982_v34  ;;  %v984_v55 = vadd.f32 %v983_v43, %v665_v17  ;;  %v826_v49 = vpop.f32.mrf.mxu0  ;;  %v1103_v17 = vld [vmem:[#allocation6 + $0x770] sm:$0xff]  ;;  %v1163_v21 = vmul.f32 %v2305_v23, %v1099_v14  ;;  %v1105_v34 = vld [vmem:[#allocation6 + $0x780] sm:$0xff]  ;;  %v1162_v12 = vmul.f32 %v2308_v32, %v1098_v25  ;;  %v1112_v19 = vld [vmem:[#allocation6 + $0x7b8] sm:$0xff] }
 0x1ae   : > { %v1725_v31 = vpop.eup %1724  ;;  %1750 = vtanh.f32 %v823_v44  ;;  %v827_v39 = vadd.f32 %v826_v49, %v666_v36  ;;  %v987_v40 = vpop.f32.mrf.mxu1  ;;  %v1213_v36 = vadd.f32 %v1212_v58, %v1154_v60  ;;  %v1193_v46 = vadd.f32 %v1192_v15, %v1157_v3  ;;  %v1108_v58 = vld [vmem:[#allocation6 + $0x798] sm:$0xff]  ;;  %v1114_v14 = vld [vmem:[#allocation6 + $0x7c8] sm:$0xff] }
 0x1af   : > { %v1727_v47 = vpop.eup %1726  ;;  %1752 = vtanh.f32 %v984_v55  ;;  %v988_v57 = vadd.f32 %v987_v40, %v668_v42  ;;  %v828_v63 = vpop.f32.mrf.mxu0  ;;  %v1165_v45 = vmul.f32 %v1723_v9, %v1101_v18  ;;  %v1255_v43 = vadd.f32 %v1254_v48, %v1156_v8  ;;  %v1110_v40 = vld [vmem:[#allocation6 + $0x7a8] sm:$0xff] }
 0x1b0   : > { %v1729_v59 = vpop.eup %1728  ;;  %1754 = vtanh.f32 %v827_v39  ;;  %v829_v7 = vadd.f32 %v828_v63, %v667_v30  ;;  %v989_v13 = vpop.f32.mrf.mxu1  ;;  %v1235_v42 = vadd.f32 %v1234_v27, %v1159_v28  ;;  %v1164_v50 = vmul.f32 %v2311_v20, %v1100_v16  ;;  %v1116_v28 = vld [vmem:[#allocation6 + $0x7d8] sm:$0xff]  ;;  %v1119_v27 = vld [vmem:[#allocation6 + $0x7f0] sm:$0xff] }
 0x1b1   : > { %v1731_v6 = vpop.eup %1730  ;;  %1756 = vtanh.f32 %v988_v57  ;;  %v990_v62 = vadd.f32 %v989_v13, %v669_v41  ;;  %v1167_v29 = vmul.f32 %v1725_v31, %v1103_v17  ;;  %v1214_v53 = vadd.f32 %v1213_v36, %v1158_v5  ;;  %v1113_v41 = vld [vmem:[#allocation6 + $0x7c0] sm:$0xff]  ;;  %v1115_v57 = vld [vmem:[#allocation6 + $0x7d0] sm:$0xff] }
 0x1b2   : > { %v1733_v22 = vpop.eup %1732  ;;  %1758 = vtanh.f32 %v829_v7  ;;  %v1194_v55 = vadd.f32 %v1193_v46, %v1161_v26  ;;  %v1166_v49 = vmul.f32 %v1727_v47, %v1102_v33  ;;  %v1169_v30 = vmul.f32 %v1731_v6, %v1105_v34  ;;  %v1117_v5 = vld [vmem:[#allocation6 + $0x7e0] sm:$0xff] }
 0x1b3   : > { %v1735_v11 = vpop.eup %1734  ;;  %1760 = vtanh.f32 %v990_v62  ;;  %v1256_v32 = vadd.f32 %v1255_v43, %v1160_v10  ;;  %v1236_v9 = vadd.f32 %v1235_v42, %v1163_v21  ;;  %v1168_v38 = vmul.f32 %v1729_v59, %v1104_v24  ;;  %v1120_v24 = vld [vmem:[#allocation6 + $0x7f8] sm:$0xff] }
 0x1b4   : > { %v1737_v35 = vpop.eup %1736  ;;  %v1171_v39 = vmul.f32 %v1733_v22, %v1107_v4  ;;  %v1215_v51 = vadd.f32 %v1214_v53, %v1162_v12  ;;  %v1195_v20 = vadd.f32 %v1194_v55, %v1165_v45  ;;  %v1170_v31 = vmul.f32 %v1735_v11, %v1106_v56 }
 0x1b5   : > { %v1739_v44 = vpop.eup %1738  ;;  %v1257_v60 = vadd.f32 %v1256_v32, %v1164_v50  ;;  %v1237_v47 = vadd.f32 %v1236_v9, %v1167_v29  ;;  %v1172_v3 = vmul.f32 %v1737_v35, %v1108_v58  ;;  %v1118_v35 = vld [vmem:[#allocation6 + $0x7e8] sm:$0xff] }
 0x1b6   : > { %v1741_v23 = vpop.eup %1740  ;;  %v1173_v52 = vmul.f32 %v1739_v44, %v1109_v1  ;;  %v1216_v13 = vadd.f32 %v1215_v51, %v1166_v49  ;;  %v1196_v6 = vadd.f32 %v1195_v20, %v1169_v30 }
 0x1b7   : > { %v1743_v54 = vpop.eup %1742  ;;  %v1175_v61 = vmul.f32 %v1741_v23, %v1111_v37  ;;  %v1258_v18 = vadd.f32 %v1257_v60, %v1168_v38  ;;  %v1238_v62 = vadd.f32 %v1237_v47, %v1171_v39 }
 0x1b8   : > { %v1745_v48 = vpop.eup %1744  ;;  %v1174_v59 = vmul.f32 %v1743_v54, %v1110_v40  ;;  %v1217_v16 = vadd.f32 %v1216_v13, %v1170_v31  ;;  %v1197_v17 = vadd.f32 %v1196_v6, %v1173_v52  ;;  %v1920_v31 = vmov 1966171168  }
 0x1b9   : > { %v1747_v63 = vpop.eup %1746  ;;  %v1176_v22 = vmul.f32 %v1745_v48, %v1112_v19  ;;  %v1259_v21 = vadd.f32 %v1258_v18, %v1172_v3  ;;  %v1239_v33 = vadd.f32 %v1238_v62, %v1175_v61  ;;  %v1282_v52 = vunpack.c.l.s4 %v1920_v31 }
 0x1ba   : > { %v1749_v7 = vpop.eup %1748  ;;  %v1177_v8 = vmul.f32 %v1747_v63, %v1113_v41  ;;  %v1218_v46 = vadd.f32 %v1217_v16, %v1174_v59  ;;  %v1270_v59 = vstv %s1269_s22 }
 0x1bb   : > { %v1751_v25 = vpop.eup %1750  ;;  %v1179_v15 = vmul.f32 %v1749_v7, %v1115_v57  ;;  %v1260_v44 = vadd.f32 %v1259_v21, %v1176_v22  ;;  %v1283_v7 = vunpack.c.0.s8 %v1282_v52 }
 0x1bc   : > { %v1753_v26 = vpop.eup %1752  ;;  %v1178_v11 = vmul.f32 %v1751_v25, %v1114_v14  ;;  %v1198_v12 = vadd.f32 %v1197_v17, %v1177_v8 }
 0x1bd   : > { %v1755_v10 = vpop.eup %1754  ;;  %v1180_v34 = vmul.f32 %v1753_v26, %v1116_v28  ;;  %v1240_v43 = vadd.f32 %v1239_v33, %v1179_v15  ;;  %v1286_v62 = vsub.s32 %v1283_v7, %v2085_v2 }
 0x1be   : > { %v1757_v36 = vpop.eup %1756  ;;  %v1181_v45 = vmul.f32 %v1755_v10, %v1117_v5  ;;  %v1219_v29 = vadd.f32 %v1218_v46, %v1178_v11 }
 0x1bf   : > { %v1759_v4 = vpop.eup %1758  ;;  %v1183_v42 = vmul.f32 %v1757_v36, %v1119_v27  ;;  %v1261_v23 = vadd.f32 %v1260_v44, %v1180_v34 }
 0x1c0   : > { %v1761_v50 = vpop.eup %1760  ;;  %v1199_v56 = vadd.f32 %v1198_v12, %v1181_v45  ;;  %v1182_v1 = vmul.f32 %v1759_v4, %v1118_v35 }
 0x1c1   : > { %v1241_v53 = vadd.f32 %v1240_v43, %v1183_v42  ;;  %v1184_v55 = vmul.f32 %v1761_v50, %v1120_v24 }
 0x1c2   : > { %v1200_v49 = vrot.slane %v1199_v56, 4  ;;  %v1220_v30 = vadd.f32 %v1219_v29, %v1182_v1 }
 0x1c3   : > { %v1242_v58 = vrot.slane %v1241_v53, 4  ;;  %v1262_v37 = vadd.f32 %v1261_v23, %v1184_v55 }
 0x1c4   : > { %v1201_v54 = vadd.f32 %v1200_v49, %v1199_v56  ;;  %v1221_v32 = vrot.slane %v1220_v30, 4 }
 0x1c5   : > { %v1243_v9 = vadd.f32 %v1242_v58, %v1241_v53  ;;  %v1263_v38 = vrot.slane %v1262_v37, 4 }
 0x1c6   : > { %v1202_v39 = vrot.slane %v1201_v54, 2  ;;  %v1222_v40 = vadd.f32 %v1221_v32, %v1220_v30 }
 0x1c7   : > { %v1244_v41 = vrot.slane %v1243_v9, 2  ;;  %v1264_v48 = vadd.f32 %v1263_v38, %v1262_v37 }
 0x1c8   : > { %v1203_v51 = vadd.f32 %v1202_v39, %v1201_v54  ;;  %v1223_v20 = vrot.slane %v1222_v40, 2 }
 0x1c9   : > { %v1245_v19 = vadd.f32 %v1244_v41, %v1243_v9  ;;  %v1265_v57 = vrot.slane %v1264_v48, 2 }
 0x1ca   : > { %v1204_v63 = vrot.slane %v1203_v51, 1  ;;  %v1224_v60 = vadd.f32 %v1223_v20, %v1222_v40 }
 0x1cb   : > { %v1246_v47 = vrot.slane %v1245_v19, 1  ;;  %v1266_v3 = vadd.f32 %v1265_v57, %v1264_v48 }
 0x1cc   : > { %v1205_v61 = vadd.f32 %v1204_v63, %v1203_v51  ;;  %v1225_v14 = vrot.slane %v1224_v60, 1 }
 0x1cd   : > { %v1247_v13 = vadd.f32 %v1246_v47, %v1245_v19  ;;  %v1267_v6 = vrot.slane %v1266_v3, 1 }
 0x1ce   : > { %v1226_v8 = vadd.f32 %v1225_v14, %v1224_v60  ;;  %v1271_v25 = vadd.f32 %v1270_v59, %v1205_v61 }
 0x1cf   : > { %v1268_v28 = vadd.f32 %v1267_v6, %v1266_v3  ;;  %v1273_v22 = vadd.f32 %v1270_v59, %v1247_v13 }
 0x1d0   : > { %v1272_v18 = vadd.f32 %v1270_v59, %v1226_v8 }
 0x1d1   : > { %v1274_v15 = vadd.f32 %v1270_v59, %v1268_v28 }
 0x1d2   : > { %v1279_v5 = vcombine.low %v1271_v25, %v1272_v18 }
 0x1d3   : > { %v1280_v26 = vcombine.low %v1273_v22, %v1274_v15 }
 0x1d4   : > { %v1287_v16 = vrot.slane %v1279_v5, %v1286_v62 }
 0x1d5   : > { %v1294_v17 = vrot.slane %v1280_v26, %v1286_v62 }
 0x1d7   : > { %v1295_v11 = vcombine.low %v1287_v16, %v1294_v17 }
 0x1d9   : > { %v1302_v27 = vrot.slane %v1295_v11, %v1286_v62 }
 0x1db   : > { %1308 = vst.msk [vmem:[%s243_s5] sm:$0xf] %vm1306_vm0, %v1302_v27 }
 0x1dc   : > { %1855 = shalt.err (!%p1852_p9)
}
 0x1dd   : > { %s1856_s26 = scalar_lea.hbm %s1322_s12, 64  ;;  %s1860_s30 = scalar_lea.hbm %s2368_s4, 128 }
 0x1de   : > { %p1857_p13 = scmp.ne.s32.totalorder %s1322_s12, %s1856_s26  ;;  %p1861_p4 = scmp.lt.s32.totalorder %s1322_s12, %s2368_s4 }
 0x1df   : > { %p1862_p8 = scmp.lt.s32.totalorder %s1860_s30, %s1856_s26 }
 0x1e0   : > { %p1858_p5 = pnand %p1857_p13, %p2384_p0 }
 0x1e1   : > { %p1863_p7 = por %p1862_p8, %p1861_p4 }
 0x1e2   : > { %p1859_p10 = pneg %p1858_p5 }
 0x1e4   : > { %p1864_p11 = pnand %p1863_p7, %p1859_p10 }
 0x1e6   : > { %1867 = shalt.err (!%p1864_p11)
}
 0x1e7   : > { %1443 = dma.vmem_to_hbm [thread:$0]  (%p2384_p0), %s1325_s7, 64, %s1322_s12, %s1310_s13  }
 0x1e8 PF: > { %s1336_s11 = sand.u32 1, %s1898_s17   ;;  %p2385_p1 = scmp.ne.s32.totalorder %s2374_s23, 0 }
 0x1e9   : > { %p2386_p2 = scmp.ge.s32.totalorder %s1910_s20, 2  ;;  %s1337_s22 = scalar_lea.sflag [#allocation5], %s1336_s11 }
 0x1eb   : > { %p1457_p6 = pnand %p2386_p2, %p2385_p1 }
 0x1ed   : > { %p1458_p12 = pneg %p1457_p6 }
 0x1ef   : > { %1893 = dma.done.wait (%p1458_p12), %s1337_s22, 64  }
 0x1f0   : > { %1895 = vsyncadd (%p1458_p12), %s1337_s22, 4294967232  ;;  %p19_p3 = scmp.ge.s32.totalorder %s2022_s14, 4   ;;  %s2387_s17 = smov %s1902_s18 }
 0x1f1   : > { %s2388_s18 = smov %s1906_s19  ;;  %s2389_s19 = smov %s2031_s21 }
 0x1f2   : > { %s2390_s20 = smov %s2022_s14  ;;  %21 = sbr.rel (!%p19_p3) target bundleno = 8 (0x8), region = 92 }
 0x1f7   :  { %1342 = vsyncpa [#allocation4], 1 }
 0x1f8   :  { %1344 = vsyncpa [#allocation4 + $0x1], 1 }
 0x1f9   :  { %1345 = vsyncpa [#allocation7], 1 }
 0x1fa   :  { %1346 = vsyncpa [#allocation5], 1 }
 0x1fb   :  { %1348 = vsyncpa [#allocation5 + $0x1], 1 }

</bundles_post_ra>
